<compile_context>
chip_gen: v6e
topology: v6e:2x2x1
jax: 0.10.0
libtpu: 0.0.40
codegen_flags: <defaults>
</compile_context>

<pallas_src>
import jax
import jax.numpy as jnp
from jax import lax
from jax.experimental import pallas as pl
from jax.experimental.pallas import tpu as pltpu


# ----------------------------------------------------------------------------
# Pallas kernel: entire sequence in one invocation, hidden states in vregs.
# ----------------------------------------------------------------------------
def _rnn_kernel(x_ref,                      # (T*B, Din) f32, time-major (row = t*B + b)
                w0x_ref, w0h_ref, b0_ref,   # (Din,4H) bf16, (H,4H) bf16, (1,4H) f32
                w1x_ref, w1h_ref, b1_ref,   # (H,4H)  bf16, (H,4H) bf16, (1,4H) f32
                wout_ref, bout_ref,         # (H,O) f32, (1,O) f32 (de-norm folded)
                o_ref):                     # (B,O) f32 output
    B, _ = o_ref.shape
    H = w0h_ref.shape[0]
    T = x_ref.shape[0] // B
    G = 4 * H

    # Hoist loop-invariant weight loads and bias broadcasts (JAX does not CSE
    # broadcast_in_dim inside the unrolled loop).
    w0h = w0h_ref[...]
    w1x = w1x_ref[...]
    w1h = w1h_ref[...]
    b1b = jnp.broadcast_to(b1_ref[...], (B, G))

    # All layer-0 input projections (+ folded input-norm bias) in ONE MXU dot,
    # off the serial recurrence chain.  Note: raw (un-normalized) x is cast to
    # bf16 here; relative error is scale-invariant so this is benign at these scales.
    gi0_all = jnp.dot(x_ref[...].astype(jnp.bfloat16), w0x_ref[...],
                      preferred_element_type=jnp.float32) + b0_ref[...]   # (T*B, 4H)

    def gates(g, h):
        # Packed gate layout: [:, :2H] = r/z pre-activations (input+hidden summed),
        # [:, 2H:3H] = W_in x + b_in, [:, 3H:4H] = W_hn h + b_hn.
        rz = jax.nn.sigmoid(g[:, :2 * H])
        r = rz[:, :H]
        z = rz[:, H:2 * H]
        n = jnp.tanh(g[:, 2 * H:3 * H] + r * g[:, 3 * H:4 * H])
        return n + z * (h - n)          # == (1-z)*n + z*h, one fewer VPU op

    h0 = jnp.zeros((B, H), jnp.float32)
    h1 = jnp.zeros((B, H), jnp.float32)

    # T is small & static: fully unrolled straight-line loop; hidden states stay in
    # vregs, zero per-step grid/DMA/scratch overhead.
    for t in range(T):
        # ---- layer 0: only the hidden contribution is on the serial chain ----
        g0 = jnp.dot(h0.astype(jnp.bfloat16), w0h,
                     preferred_element_type=jnp.float32) + gi0_all[t * B:(t + 1) * B, :]
        h0 = gates(g0, h0)

        # ---- layer 1: two independent small dots, summed on the VPU ----
        g1 = (jnp.dot(h1.astype(jnp.bfloat16), w1h,
                      preferred_element_type=jnp.float32)
              + jnp.dot(h0.astype(jnp.bfloat16), w1x,
                        preferred_element_type=jnp.float32)
              + b1b)
        h1 = gates(g1, h1)

    # Linear head; output de-normalization already folded into wout/bout.
    o_ref[...] = jnp.dot(h1, wout_ref[...],
                         preferred_element_type=jnp.float32) + bout_ref[...]


# ----------------------------------------------------------------------------
# Wrapper
# ----------------------------------------------------------------------------
@jax.jit
def rnn_model_forward(in_xu, kparams):
    """in_xu: (B, T, Din) float32. Returns (B, obs_dim) float32."""
    B, T, Din = in_xu.shape
    O = kparams["wout"].shape[1]

    # Time-major, lane-dense slab: row t*B + b  <->  (batch b, time t).
    # Reshaping here (in XLA) keeps relayouts out of the kernel.
    x_tb = jnp.swapaxes(in_xu, 0, 1).reshape(T * B, Din)

    def full(shape):
        nd = len(shape)
        return pl.BlockSpec(shape, lambda i: (0,) * nd)

    return pl.pallas_call(
        _rnn_kernel,
        out_shape=jax.ShapeDtypeStruct((B, O), jnp.float32),
        grid_spec=pltpu.PrefetchScalarGridSpec(
            num_scalar_prefetch=0,
            grid=(1,),
            in_specs=[
                full((T * B, Din)),
                full(kparams["w0x"].shape), full(kparams["w0h"].shape),
                full(kparams["b0"].shape),
                full(kparams["w1x"].shape), full(kparams["w1h"].shape),
                full(kparams["b1"].shape),
                full(kparams["wout"].shape), full(kparams["bout"].shape),
            ],
            out_specs=pl.BlockSpec((B, O), lambda i: (0, 0)),
        ),
        compiler_params=pltpu.CompilerParams(
            dimension_semantics=("arbitrary",),
        ),
    )(
        x_tb,
        kparams["w0x"], kparams["w0h"], kparams["b0"],
        kparams["w1x"], kparams["w1h"], kparams["b1"],
        kparams["wout"], kparams["bout"],
    )


# ----------------------------------------------------------------------------
# Parameter preparation: fold normalization, split-pack per-cell weights, cast bf16.
# ----------------------------------------------------------------------------
def _pack_gru_cell(wih_t, whh_t, bih, bhh):
    """Split-pack a GRU cell into separate hidden/input weights for two dots.

    Both weights use the (·, 4H) column layout:
        [:, 0:2H]  -> r/z gates
        [:, 2H:3H] -> n gate, input contribution  (W_in; zero rows in W_h)
        [:, 3H:4H] -> n gate, hidden contribution (W_hn; zero rows in W_x)
    so x @ W_x + h @ W_h + b yields r/z pre-activations already summed and the
    n-gate input/hidden parts in fixed lane blocks.
    Bias (1, 4H): [b_ir+b_hr, b_iz+b_hz | b_in | b_hn].
    """
    Dx = wih_t.shape[0]
    H = whh_t.shape[0]
    w_h = jnp.concatenate(
        [whh_t[:, :2 * H], jnp.zeros((H, H), jnp.float32), whh_t[:, 2 * H:]], axis=1
    ).astype(jnp.bfloat16)
    w_x = jnp.concatenate(
        [wih_t[:, :2 * H], wih_t[:, 2 * H:], jnp.zeros((Dx, H), jnp.float32)], axis=1
    ).astype(jnp.bfloat16)
    b = jnp.concatenate(
        [bih[:, :2 * H] + bhh[:, :2 * H], bih[:, 2 * H:], bhh[:, 2 * H:]], axis=1
    ).astype(jnp.float32)
    return w_x, w_h, b


def prepare_kernel_params(params):
    """Fold input/output normalization into the weights and pack for the kernel."""
    Din = params["wih0_t"].shape[0]

    # (x - m)/s @ W + b  ==  x @ (W / s) + (b - (m/s) @ W)   (exact f32 algebra)
    inv_std = 1.0 / params["in_std"]                                  # (1, Din)
    wih0_f = params["wih0_t"] * inv_std.reshape(Din, 1)
    bih0_f = params["bih0"] - (params["in_mean"] * inv_std) @ params["wih0_t"]

    w0x, w0h, b0 = _pack_gru_cell(wih0_f, params["whh0_t"], bih0_f, params["bhh0"])
    w1x, w1h, b1 = _pack_gru_cell(params["wih1_t"], params["whh1_t"],
                                  params["bih1"], params["bhh1"])

    # (h @ W + b) * std + mean  ==  h @ (W * std) + (b * std + mean)
    wout = (params["wout_t"] * params["out_std"]).astype(jnp.float32)
    bout = (params["bout"] * params["out_std"] + params["out_mean"]).astype(jnp.float32)
    return {"w0x": w0x, "w0h": w0h, "b0": b0,
            "w1x": w1x, "w1h": w1h, "b1": b1,
            "wout": wout, "bout": bout}


# ----------------------------------------------------------------------------
# Pure-JAX references.
# ----------------------------------------------------------------------------
def reference_forward(in_xu, params):
    """Float32 reference mirroring torch RNNModel.forward semantics."""
    H = params["whh0_t"].shape[0]
    x = (in_xu - params["in_mean"]) / params["in_std"]

    def cell(x_in, h, wih_t, whh_t, bih, bhh):
        gi = x_in @ wih_t + bih
        gh = h @ whh_t + bhh
        r = jax.nn.sigmoid(gi[:, :H] + gh[:, :H])
        z = jax.nn.sigmoid(gi[:, H:2 * H] + gh[:, H:2 * H])
        n = jnp.tanh(gi[:, 2 * H:] + r * gh[:, 2 * H:])
        return (1.0 - z) * n + z * h

    B = in_xu.shape[0]
    h0 = jnp.zeros((B, H), jnp.float32)
    h1 = jnp.zeros((B, H), jnp.float32)

    def step(carry, x_t):
        h0, h1 = carry
        h0 = cell(x_t, h0, params["wih0_t"], params["whh0_t"],
                  params["bih0"], params["bhh0"])
        h1 = cell(h0, h1, params["wih1_t"], params["whh1_t"],
                  params["bih1"], params["bhh1"])
        return (h0, h1), None

    (_, h1), _ = lax.scan(step, (h0, h1), jnp.swapaxes(x, 0, 1))
    y = h1 @ params["wout_t"] + params["bout"]
    return y * params["out_std"] + params["out_mean"]


def reference_forward_packed(in_xu, kp):
    """Mirror of the exact kernel math (split-packed bf16 weights, f32 accumulation)."""
    H = kp["w0h"].shape[0]
    B, T, Din = in_xu.shape

    x_tb = jnp.swapaxes(in_xu, 0, 1).reshape(T * B, Din)
    gi0_all = (jnp.dot(x_tb.astype(jnp.bfloat16), kp["w0x"],
                       preferred_element_type=jnp.float32)
               + kp["b0"]).reshape(T, B, 4 * H)

    def gates(g, h):
        rz = jax.nn.sigmoid(g[:, :2 * H])
        r, z = rz[:, :H], rz[:, H:2 * H]
        n = jnp.tanh(g[:, 2 * H:3 * H] + r * g[:, 3 * H:4 * H])
        return n + z * (h - n)

    def step(carry, gi0):
        h0, h1 = carry
        g0 = jnp.dot(h0.astype(jnp.bfloat16), kp["w0h"],
                     preferred_element_type=jnp.float32) + gi0
        h0 = gates(g0, h0)
        g1 = (jnp.dot(h1.astype(jnp.bfloat16), kp["w1h"],
                      preferred_element_type=jnp.float32)
              + jnp.dot(h0.astype(jnp.bfloat16), kp["w1x"],
                        preferred_element_type=jnp.float32)
              + kp["b1"])
        h1 = gates(g1, h1)
        return (h0, h1), None

    init = (jnp.zeros((B, H), jnp.float32), jnp.zeros((B, H), jnp.float32))
    (_, h1), _ = lax.scan(step, init, gi0_all)
    return jnp.dot(h1, kp["wout"], preferred_element_type=jnp.float32) + kp["bout"]


# ----------------------------------------------------------------------------
# Deterministic parameter construction (shapes per RNNModel.__init__).
# ----------------------------------------------------------------------------
def make_params(key, obs_dim, action_dim, hidden_dim, states_actions_train):
    Din = obs_dim + action_dim
    H = hidden_dim
    ks = jax.random.split(key, 12)
    bound = 1.0 / jnp.sqrt(jnp.float32(H))
    u = lambda k, shape: jax.random.uniform(k, shape, jnp.float32, -bound, bound)

    in_mean = states_actions_train.mean((0, 1))
    in_std = states_actions_train.std((0, 1))
    in_std = jnp.where(in_std == 0, jnp.ones_like(in_std), in_std)
    out_mean = states_actions_train[:, :, :obs_dim].mean((0, 1))
    out_std = states_actions_train[:, :, :obs_dim].std((0, 1))
    out_std = jnp.where(out_std == 0, jnp.ones_like(out_std), out_std)

    return {
        # GRU layer 0 (weights stored pre-transposed for x @ W^T), gate order [r,z,n].
        "wih0_t": u(ks[0], (3 * H, Din)).T,
        "whh0_t": u(ks[1], (3 * H, H)).T,
        "bih0": u(ks[2], (1, 3 * H)),
        "bhh0": u(ks[3], (1, 3 * H)),
        # GRU layer 1.
        "wih1_t": u(ks[4], (3 * H, H)).T,
        "whh1_t": u(ks[5], (3 * H, H)).T,
        "bih1": u(ks[6], (1, 3 * H)),
        "bhh1": u(ks[7], (1, 3 * H)),
        # Linear head.
        "wout_t": u(ks[8], (obs_dim, H)).T,
        "bout": u(ks[9], (1, obs_dim)),
        # Normalization buffers.
        "in_mean": in_mean.reshape(1, Din).astype(jnp.float32),
        "in_std": in_std.reshape(1, Din).astype(jnp.float32),
        "out_mean": out_mean.reshape(1, obs_dim).astype(jnp.float32),
        "out_std": out_std.reshape(1, obs_dim).astype(jnp.float32),
    }


if __name__ == "__main__":
    obs_dim, action_dim, hidden_dim = 4, 2, 32
    B, T = 2, 8
    Din = obs_dim + action_dim

    key = jax.random.PRNGKey(0)
    k_train, k_x, k_p = jax.random.split(key, 3)

    # Synthetic "training data" used only to build the normalization buffers.
    states_actions_train = jax.random.normal(k_train, (5, T, Din), jnp.float32)
    params = make_params(k_p, obs_dim, action_dim, hidden_dim, states_actions_train)
    kparams = prepare_kernel_params(params)

    in_xu = jax.random.normal(k_x, (B, T, Din), jnp.float32)

    out = rnn_model_forward(in_xu, kparams)
    out = jax.block_until_ready(out)
    assert out.shape == (B, obs_dim)

    # Strict check vs a pure-JAX mirror of the kernel math (same packed bf16 weights).
    ref_packed = reference_forward_packed(in_xu, kparams)
    assert jnp.allclose(out, ref_packed, atol=2e-3, rtol=2e-3), (out, ref_packed)

    # Semantic check vs the full-f32 torch-style reference (bf16 recurrent matmuls
    # introduce a small, bounded error at T=8).
    ref_f32 = reference_forward(in_xu, params)
    assert jnp.allclose(out, ref_f32, atol=5e-2, rtol=5e-2), (out, ref_f32)

    print("KERNEL_OK")
</pallas_src>

<mosaic_0001>
module attributes {stable_mosaic.version = 11 : i64} {
  func.func @_rnn_kernel(%arg0: i32, %arg1: memref<16x6xf32, #tpu.memory_space<vmem>>, %arg2: memref<6x128xbf16, #tpu.memory_space<vmem>>, %arg3: memref<32x128xbf16, #tpu.memory_space<vmem>>, %arg4: memref<1x128xf32, #tpu.memory_space<vmem>>, %arg5: memref<32x128xbf16, #tpu.memory_space<vmem>>, %arg6: memref<32x128xbf16, #tpu.memory_space<vmem>>, %arg7: memref<1x128xf32, #tpu.memory_space<vmem>>, %arg8: memref<32x4xf32, #tpu.memory_space<vmem>>, %arg9: memref<1x4xf32, #tpu.memory_space<vmem>>, %arg10: memref<2x4xf32, #tpu.memory_space<vmem>>) attributes {dimension_semantics = [#tpu.dimension_semantics<arbitrary>], iteration_bounds = array<i64: 1>, scalar_prefetch = 0 : i64, scratch_operands = 0 : i64, tpu.core_type = #tpu.core_type<tc>, window_params = [{pipeline_mode = #tpu.pipeline_mode<synchronous>, transform_indices = @transform_0, window_bounds = array<i64: 16, 6>}, {pipeline_mode = #tpu.pipeline_mode<synchronous>, transform_indices = @transform_1, window_bounds = array<i64: 6, 128>}, {pipeline_mode = #tpu.pipeline_mode<synchronous>, transform_indices = @transform_2, window_bounds = array<i64: 32, 128>}, {pipeline_mode = #tpu.pipeline_mode<synchronous>, transform_indices = @transform_3, window_bounds = array<i64: 1, 128>}, {pipeline_mode = #tpu.pipeline_mode<synchronous>, transform_indices = @transform_4, window_bounds = array<i64: 32, 128>}, {pipeline_mode = #tpu.pipeline_mode<synchronous>, transform_indices = @transform_5, window_bounds = array<i64: 32, 128>}, {pipeline_mode = #tpu.pipeline_mode<synchronous>, transform_indices = @transform_6, window_bounds = array<i64: 1, 128>}, {pipeline_mode = #tpu.pipeline_mode<synchronous>, transform_indices = @transform_7, window_bounds = array<i64: 32, 4>}, {pipeline_mode = #tpu.pipeline_mode<synchronous>, transform_indices = @transform_8, window_bounds = array<i64: 1, 4>}, {pipeline_mode = #tpu.pipeline_mode<synchronous>, transform_indices = @transform_9, window_bounds = array<i64: 2, 4>}]} {
    %c0 = arith.constant 0 : index
    %c0_0 = arith.constant 0 : index
    %0 = vector.load %arg3[%c0, %c0_0] : memref<32x128xbf16, #tpu.memory_space<vmem>>, vector<32x128xbf16>
    %c0_1 = arith.constant 0 : index
    %c0_2 = arith.constant 0 : index
    %1 = vector.load %arg5[%c0_1, %c0_2] : memref<32x128xbf16, #tpu.memory_space<vmem>>, vector<32x128xbf16>
    %c0_3 = arith.constant 0 : index
    %c0_4 = arith.constant 0 : index
    %2 = vector.load %arg6[%c0_3, %c0_4] : memref<32x128xbf16, #tpu.memory_space<vmem>>, vector<32x128xbf16>
    %c0_5 = arith.constant 0 : index
    %c0_6 = arith.constant 0 : index
    %3 = vector.load %arg7[%c0_5, %c0_6] : memref<1x128xf32, #tpu.memory_space<vmem>>, vector<1x128xf32>
    %4 = vector.shape_cast %3 : vector<1x128xf32> to vector<1x128xf32>
    %5 = vector.broadcast %4 : vector<1x128xf32> to vector<2x128xf32>
    %c0_7 = arith.constant 0 : index
    %c0_8 = arith.constant 0 : index
    %6 = vector.load %arg1[%c0_7, %c0_8] : memref<16x6xf32, #tpu.memory_space<vmem>>, vector<16x6xf32>
    %7 = arith.truncf %6 : vector<16x6xf32> to vector<16x6xbf16>
    %c0_9 = arith.constant 0 : index
    %c0_10 = arith.constant 0 : index
    %8 = vector.load %arg2[%c0_9, %c0_10] : memref<6x128xbf16, #tpu.memory_space<vmem>>, vector<6x128xbf16>
    %cst = arith.constant dense<0.000000e+00> : vector<16x128xf32>
    %9 = tpu.matmul %7, %8, %cst {dimension_numbers = #tpu.dot_dimension_numbers<[1], [0], [0], [1], [0, 0, 1, 1], [], []>} : vector<16x6xbf16>, vector<6x128xbf16>, vector<16x128xf32> -> vector<16x128xf32>
    %c0_11 = arith.constant 0 : index
    %c0_12 = arith.constant 0 : index
    %10 = vector.load %arg4[%c0_11, %c0_12] : memref<1x128xf32, #tpu.memory_space<vmem>>, vector<1x128xf32>
    %11 = vector.broadcast %10 : vector<1x128xf32> to vector<16x128xf32>
    %12 = arith.addf %9, %11 : vector<16x128xf32>
    %cst_13 = arith.constant 0.000000e+00 : f32
    %13 = vector.broadcast %cst_13 : f32 to vector<2x32xf32>
    %cst_14 = arith.constant 0.000000e+00 : f32
    %14 = vector.broadcast %cst_14 : f32 to vector<2x32xf32>
    %15 = arith.truncf %13 : vector<2x32xf32> to vector<2x32xbf16>
    %cst_15 = arith.constant dense<0.000000e+00> : vector<2x128xf32>
    %16 = tpu.matmul %15, %0, %cst_15 {dimension_numbers = #tpu.dot_dimension_numbers<[1], [0], [0], [1], [0, 0, 1, 1], [], []>} : vector<2x32xbf16>, vector<32x128xbf16>, vector<2x128xf32> -> vector<2x128xf32>
    %17 = vector.extract_strided_slice %12 {offsets = [0, 0], sizes = [2, 128], strides = [1, 1]} : vector<16x128xf32> to vector<2x128xf32>
    %18 = arith.addf %16, %17 : vector<2x128xf32>
    %19 = vector.extract_strided_slice %18 {offsets = [0, 0], sizes = [2, 64], strides = [1, 1]} : vector<2x128xf32> to vector<2x64xf32>
    %20 = arith.negf %19 : vector<2x64xf32>
    %21 = math.exp %20 : vector<2x64xf32>
    %cst_16 = arith.constant 1.000000e+00 : f32
    %22 = vector.broadcast %cst_16 : f32 to vector<2x64xf32>
    %23 = arith.addf %22, %21 : vector<2x64xf32>
    %24 = arith.divf %22, %23 : vector<2x64xf32>
    %25 = vector.extract_strided_slice %24 {offsets = [0, 0], sizes = [2, 32], strides = [1, 1]} : vector<2x64xf32> to vector<2x32xf32>
    %26 = vector.extract_strided_slice %24 {offsets = [0, 32], sizes = [2, 32], strides = [1, 1]} : vector<2x64xf32> to vector<2x32xf32>
    %27 = vector.extract_strided_slice %18 {offsets = [0, 64], sizes = [2, 32], strides = [1, 1]} : vector<2x128xf32> to vector<2x32xf32>
    %28 = vector.extract_strided_slice %18 {offsets = [0, 96], sizes = [2, 32], strides = [1, 1]} : vector<2x128xf32> to vector<2x32xf32>
    %29 = arith.mulf %25, %28 : vector<2x32xf32>
    %30 = arith.addf %27, %29 : vector<2x32xf32>
    %31 = math.tanh %30 : vector<2x32xf32>
    %32 = arith.subf %13, %31 : vector<2x32xf32>
    %33 = arith.mulf %26, %32 : vector<2x32xf32>
    %34 = arith.addf %31, %33 : vector<2x32xf32>
    %35 = arith.truncf %14 : vector<2x32xf32> to vector<2x32xbf16>
    %cst_17 = arith.constant dense<0.000000e+00> : vector<2x128xf32>
    %36 = tpu.matmul %35, %2, %cst_17 {dimension_numbers = #tpu.dot_dimension_numbers<[1], [0], [0], [1], [0, 0, 1, 1], [], []>} : vector<2x32xbf16>, vector<32x128xbf16>, vector<2x128xf32> -> vector<2x128xf32>
    %37 = arith.truncf %34 : vector<2x32xf32> to vector<2x32xbf16>
    %cst_18 = arith.constant dense<0.000000e+00> : vector<2x128xf32>
    %38 = tpu.matmul %37, %1, %cst_18 {dimension_numbers = #tpu.dot_dimension_numbers<[1], [0], [0], [1], [0, 0, 1, 1], [], []>} : vector<2x32xbf16>, vector<32x128xbf16>, vector<2x128xf32> -> vector<2x128xf32>
    %39 = arith.addf %36, %38 : vector<2x128xf32>
    %40 = arith.addf %39, %5 : vector<2x128xf32>
    %41 = vector.extract_strided_slice %40 {offsets = [0, 0], sizes = [2, 64], strides = [1, 1]} : vector<2x128xf32> to vector<2x64xf32>
    %42 = arith.negf %41 : vector<2x64xf32>
    %43 = math.exp %42 : vector<2x64xf32>
    %cst_19 = arith.constant 1.000000e+00 : f32
    %44 = vector.broadcast %cst_19 : f32 to vector<2x64xf32>
    %45 = arith.addf %44, %43 : vector<2x64xf32>
    %46 = arith.divf %44, %45 : vector<2x64xf32>
    %47 = vector.extract_strided_slice %46 {offsets = [0, 0], sizes = [2, 32], strides = [1, 1]} : vector<2x64xf32> to vector<2x32xf32>
    %48 = vector.extract_strided_slice %46 {offsets = [0, 32], sizes = [2, 32], strides = [1, 1]} : vector<2x64xf32> to vector<2x32xf32>
    %49 = vector.extract_strided_slice %40 {offsets = [0, 64], sizes = [2, 32], strides = [1, 1]} : vector<2x128xf32> to vector<2x32xf32>
    %50 = vector.extract_strided_slice %40 {offsets = [0, 96], sizes = [2, 32], strides = [1, 1]} : vector<2x128xf32> to vector<2x32xf32>
    %51 = arith.mulf %47, %50 : vector<2x32xf32>
    %52 = arith.addf %49, %51 : vector<2x32xf32>
    %53 = math.tanh %52 : vector<2x32xf32>
    %54 = arith.subf %14, %53 : vector<2x32xf32>
    %55 = arith.mulf %48, %54 : vector<2x32xf32>
    %56 = arith.addf %53, %55 : vector<2x32xf32>
    %57 = arith.truncf %34 : vector<2x32xf32> to vector<2x32xbf16>
    %cst_20 = arith.constant dense<0.000000e+00> : vector<2x128xf32>
    %58 = tpu.matmul %57, %0, %cst_20 {dimension_numbers = #tpu.dot_dimension_numbers<[1], [0], [0], [1], [0, 0, 1, 1], [], []>} : vector<2x32xbf16>, vector<32x128xbf16>, vector<2x128xf32> -> vector<2x128xf32>
    %59 = vector.extract_strided_slice %12 {offsets = [2, 0], sizes = [2, 128], strides = [1, 1]} : vector<16x128xf32> to vector<2x128xf32>
    %60 = arith.addf %58, %59 : vector<2x128xf32>
    %61 = vector.extract_strided_slice %60 {offsets = [0, 0], sizes = [2, 64], strides = [1, 1]} : vector<2x128xf32> to vector<2x64xf32>
    %62 = arith.negf %61 : vector<2x64xf32>
    %63 = math.exp %62 : vector<2x64xf32>
    %cst_21 = arith.constant 1.000000e+00 : f32
    %64 = vector.broadcast %cst_21 : f32 to vector<2x64xf32>
    %65 = arith.addf %64, %63 : vector<2x64xf32>
    %66 = arith.divf %64, %65 : vector<2x64xf32>
    %67 = vector.extract_strided_slice %66 {offsets = [0, 0], sizes = [2, 32], strides = [1, 1]} : vector<2x64xf32> to vector<2x32xf32>
    %68 = vector.extract_strided_slice %66 {offsets = [0, 32], sizes = [2, 32], strides = [1, 1]} : vector<2x64xf32> to vector<2x32xf32>
    %69 = vector.extract_strided_slice %60 {offsets = [0, 64], sizes = [2, 32], strides = [1, 1]} : vector<2x128xf32> to vector<2x32xf32>
    %70 = vector.extract_strided_slice %60 {offsets = [0, 96], sizes = [2, 32], strides = [1, 1]} : vector<2x128xf32> to vector<2x32xf32>
    %71 = arith.mulf %67, %70 : vector<2x32xf32>
    %72 = arith.addf %69, %71 : vector<2x32xf32>
    %73 = math.tanh %72 : vector<2x32xf32>
    %74 = arith.subf %34, %73 : vector<2x32xf32>
    %75 = arith.mulf %68, %74 : vector<2x32xf32>
    %76 = arith.addf %73, %75 : vector<2x32xf32>
    %77 = arith.truncf %56 : vector<2x32xf32> to vector<2x32xbf16>
    %cst_22 = arith.constant dense<0.000000e+00> : vector<2x128xf32>
    %78 = tpu.matmul %77, %2, %cst_22 {dimension_numbers = #tpu.dot_dimension_numbers<[1], [0], [0], [1], [0, 0, 1, 1], [], []>} : vector<2x32xbf16>, vector<32x128xbf16>, vector<2x128xf32> -> vector<2x128xf32>
    %79 = arith.truncf %76 : vector<2x32xf32> to vector<2x32xbf16>
    %cst_23 = arith.constant dense<0.000000e+00> : vector<2x128xf32>
    %80 = tpu.matmul %79, %1, %cst_23 {dimension_numbers = #tpu.dot_dimension_numbers<[1], [0], [0], [1], [0, 0, 1, 1], [], []>} : vector<2x32xbf16>, vector<32x128xbf16>, vector<2x128xf32> -> vector<2x128xf32>
    %81 = arith.addf %78, %80 : vector<2x128xf32>
    %82 = arith.addf %81, %5 : vector<2x128xf32>
    %83 = vector.extract_strided_slice %82 {offsets = [0, 0], sizes = [2, 64], strides = [1, 1]} : vector<2x128xf32> to vector<2x64xf32>
    %84 = arith.negf %83 : vector<2x64xf32>
    %85 = math.exp %84 : vector<2x64xf32>
    %cst_24 = arith.constant 1.000000e+00 : f32
    %86 = vector.broadcast %cst_24 : f32 to vector<2x64xf32>
    %87 = arith.addf %86, %85 : vector<2x64xf32>
    %88 = arith.divf %86, %87 : vector<2x64xf32>
    %89 = vector.extract_strided_slice %88 {offsets = [0, 0], sizes = [2, 32], strides = [1, 1]} : vector<2x64xf32> to vector<2x32xf32>
    %90 = vector.extract_strided_slice %88 {offsets = [0, 32], sizes = [2, 32], strides = [1, 1]} : vector<2x64xf32> to vector<2x32xf32>
    %91 = vector.extract_strided_slice %82 {offsets = [0, 64], sizes = [2, 32], strides = [1, 1]} : vector<2x128xf32> to vector<2x32xf32>
    %92 = vector.extract_strided_slice %82 {offsets = [0, 96], sizes = [2, 32], strides = [1, 1]} : vector<2x128xf32> to vector<2x32xf32>
    %93 = arith.mulf %89, %92 : vector<2x32xf32>
    %94 = arith.addf %91, %93 : vector<2x32xf32>
    %95 = math.tanh %94 : vector<2x32xf32>
    %96 = arith.subf %56, %95 : vector<2x32xf32>
    %97 = arith.mulf %90, %96 : vector<2x32xf32>
    %98 = arith.addf %95, %97 : vector<2x32xf32>
    %99 = arith.truncf %76 : vector<2x32xf32> to vector<2x32xbf16>
    %cst_25 = arith.constant dense<0.000000e+00> : vector<2x128xf32>
    %100 = tpu.matmul %99, %0, %cst_25 {dimension_numbers = #tpu.dot_dimension_numbers<[1], [0], [0], [1], [0, 0, 1, 1], [], []>} : vector<2x32xbf16>, vector<32x128xbf16>, vector<2x128xf32> -> vector<2x128xf32>
    %101 = vector.extract_strided_slice %12 {offsets = [4, 0], sizes = [2, 128], strides = [1, 1]} : vector<16x128xf32> to vector<2x128xf32>
    %102 = arith.addf %100, %101 : vector<2x128xf32>
    %103 = vector.extract_strided_slice %102 {offsets = [0, 0], sizes = [2, 64], strides = [1, 1]} : vector<2x128xf32> to vector<2x64xf32>
    %104 = arith.negf %103 : vector<2x64xf32>
    %105 = math.exp %104 : vector<2x64xf32>
    %cst_26 = arith.constant 1.000000e+00 : f32
    %106 = vector.broadcast %cst_26 : f32 to vector<2x64xf32>
    %107 = arith.addf %106, %105 : vector<2x64xf32>
    %108 = arith.divf %106, %107 : vector<2x64xf32>
    %109 = vector.extract_strided_slice %108 {offsets = [0, 0], sizes = [2, 32], strides = [1, 1]} : vector<2x64xf32> to vector<2x32xf32>
    %110 = vector.extract_strided_slice %108 {offsets = [0, 32], sizes = [2, 32], strides = [1, 1]} : vector<2x64xf32> to vector<2x32xf32>
    %111 = vector.extract_strided_slice %102 {offsets = [0, 64], sizes = [2, 32], strides = [1, 1]} : vector<2x128xf32> to vector<2x32xf32>
    %112 = vector.extract_strided_slice %102 {offsets = [0, 96], sizes = [2, 32], strides = [1, 1]} : vector<2x128xf32> to vector<2x32xf32>
    %113 = arith.mulf %109, %112 : vector<2x32xf32>
    %114 = arith.addf %111, %113 : vector<2x32xf32>
    %115 = math.tanh %114 : vector<2x32xf32>
    %116 = arith.subf %76, %115 : vector<2x32xf32>
    %117 = arith.mulf %110, %116 : vector<2x32xf32>
    %118 = arith.addf %115, %117 : vector<2x32xf32>
    %119 = arith.truncf %98 : vector<2x32xf32> to vector<2x32xbf16>
    %cst_27 = arith.constant dense<0.000000e+00> : vector<2x128xf32>
    %120 = tpu.matmul %119, %2, %cst_27 {dimension_numbers = #tpu.dot_dimension_numbers<[1], [0], [0], [1], [0, 0, 1, 1], [], []>} : vector<2x32xbf16>, vector<32x128xbf16>, vector<2x128xf32> -> vector<2x128xf32>
    %121 = arith.truncf %118 : vector<2x32xf32> to vector<2x32xbf16>
    %cst_28 = arith.constant dense<0.000000e+00> : vector<2x128xf32>
    %122 = tpu.matmul %121, %1, %cst_28 {dimension_numbers = #tpu.dot_dimension_numbers<[1], [0], [0], [1], [0, 0, 1, 1], [], []>} : vector<2x32xbf16>, vector<32x128xbf16>, vector<2x128xf32> -> vector<2x128xf32>
    %123 = arith.addf %120, %122 : vector<2x128xf32>
    %124 = arith.addf %123, %5 : vector<2x128xf32>
    %125 = vector.extract_strided_slice %124 {offsets = [0, 0], sizes = [2, 64], strides = [1, 1]} : vector<2x128xf32> to vector<2x64xf32>
    %126 = arith.negf %125 : vector<2x64xf32>
    %127 = math.exp %126 : vector<2x64xf32>
    %cst_29 = arith.constant 1.000000e+00 : f32
    %128 = vector.broadcast %cst_29 : f32 to vector<2x64xf32>
    %129 = arith.addf %128, %127 : vector<2x64xf32>
    %130 = arith.divf %128, %129 : vector<2x64xf32>
    %131 = vector.extract_strided_slice %130 {offsets = [0, 0], sizes = [2, 32], strides = [1, 1]} : vector<2x64xf32> to vector<2x32xf32>
    %132 = vector.extract_strided_slice %130 {offsets = [0, 32], sizes = [2, 32], strides = [1, 1]} : vector<2x64xf32> to vector<2x32xf32>
    %133 = vector.extract_strided_slice %124 {offsets = [0, 64], sizes = [2, 32], strides = [1, 1]} : vector<2x128xf32> to vector<2x32xf32>
    %134 = vector.extract_strided_slice %124 {offsets = [0, 96], sizes = [2, 32], strides = [1, 1]} : vector<2x128xf32> to vector<2x32xf32>
    %135 = arith.mulf %131, %134 : vector<2x32xf32>
    %136 = arith.addf %133, %135 : vector<2x32xf32>
    %137 = math.tanh %136 : vector<2x32xf32>
    %138 = arith.subf %98, %137 : vector<2x32xf32>
    %139 = arith.mulf %132, %138 : vector<2x32xf32>
    %140 = arith.addf %137, %139 : vector<2x32xf32>
    %141 = arith.truncf %118 : vector<2x32xf32> to vector<2x32xbf16>
    %cst_30 = arith.constant dense<0.000000e+00> : vector<2x128xf32>
    %142 = tpu.matmul %141, %0, %cst_30 {dimension_numbers = #tpu.dot_dimension_numbers<[1], [0], [0], [1], [0, 0, 1, 1], [], []>} : vector<2x32xbf16>, vector<32x128xbf16>, vector<2x128xf32> -> vector<2x128xf32>
    %143 = vector.extract_strided_slice %12 {offsets = [6, 0], sizes = [2, 128], strides = [1, 1]} : vector<16x128xf32> to vector<2x128xf32>
    %144 = arith.addf %142, %143 : vector<2x128xf32>
    %145 = vector.extract_strided_slice %144 {offsets = [0, 0], sizes = [2, 64], strides = [1, 1]} : vector<2x128xf32> to vector<2x64xf32>
    %146 = arith.negf %145 : vector<2x64xf32>
    %147 = math.exp %146 : vector<2x64xf32>
    %cst_31 = arith.constant 1.000000e+00 : f32
    %148 = vector.broadcast %cst_31 : f32 to vector<2x64xf32>
    %149 = arith.addf %148, %147 : vector<2x64xf32>
    %150 = arith.divf %148, %149 : vector<2x64xf32>
    %151 = vector.extract_strided_slice %150 {offsets = [0, 0], sizes = [2, 32], strides = [1, 1]} : vector<2x64xf32> to vector<2x32xf32>
    %152 = vector.extract_strided_slice %150 {offsets = [0, 32], sizes = [2, 32], strides = [1, 1]} : vector<2x64xf32> to vector<2x32xf32>
    %153 = vector.extract_strided_slice %144 {offsets = [0, 64], sizes = [2, 32], strides = [1, 1]} : vector<2x128xf32> to vector<2x32xf32>
    %154 = vector.extract_strided_slice %144 {offsets = [0, 96], sizes = [2, 32], strides = [1, 1]} : vector<2x128xf32> to vector<2x32xf32>
    %155 = arith.mulf %151, %154 : vector<2x32xf32>
    %156 = arith.addf %153, %155 : vector<2x32xf32>
    %157 = math.tanh %156 : vector<2x32xf32>
    %158 = arith.subf %118, %157 : vector<2x32xf32>
    %159 = arith.mulf %152, %158 : vector<2x32xf32>
    %160 = arith.addf %157, %159 : vector<2x32xf32>
    %161 = arith.truncf %140 : vector<2x32xf32> to vector<2x32xbf16>
    %cst_32 = arith.constant dense<0.000000e+00> : vector<2x128xf32>
    %162 = tpu.matmul %161, %2, %cst_32 {dimension_numbers = #tpu.dot_dimension_numbers<[1], [0], [0], [1], [0, 0, 1, 1], [], []>} : vector<2x32xbf16>, vector<32x128xbf16>, vector<2x128xf32> -> vector<2x128xf32>
    %163 = arith.truncf %160 : vector<2x32xf32> to vector<2x32xbf16>
    %cst_33 = arith.constant dense<0.000000e+00> : vector<2x128xf32>
    %164 = tpu.matmul %163, %1, %cst_33 {dimension_numbers = #tpu.dot_dimension_numbers<[1], [0], [0], [1], [0, 0, 1, 1], [], []>} : vector<2x32xbf16>, vector<32x128xbf16>, vector<2x128xf32> -> vector<2x128xf32>
    %165 = arith.addf %162, %164 : vector<2x128xf32>
    %166 = arith.addf %165, %5 : vector<2x128xf32>
    %167 = vector.extract_strided_slice %166 {offsets = [0, 0], sizes = [2, 64], strides = [1, 1]} : vector<2x128xf32> to vector<2x64xf32>
    %168 = arith.negf %167 : vector<2x64xf32>
    %169 = math.exp %168 : vector<2x64xf32>
    %cst_34 = arith.constant 1.000000e+00 : f32
    %170 = vector.broadcast %cst_34 : f32 to vector<2x64xf32>
    %171 = arith.addf %170, %169 : vector<2x64xf32>
    %172 = arith.divf %170, %171 : vector<2x64xf32>
    %173 = vector.extract_strided_slice %172 {offsets = [0, 0], sizes = [2, 32], strides = [1, 1]} : vector<2x64xf32> to vector<2x32xf32>
    %174 = vector.extract_strided_slice %172 {offsets = [0, 32], sizes = [2, 32], strides = [1, 1]} : vector<2x64xf32> to vector<2x32xf32>
    %175 = vector.extract_strided_slice %166 {offsets = [0, 64], sizes = [2, 32], strides = [1, 1]} : vector<2x128xf32> to vector<2x32xf32>
    %176 = vector.extract_strided_slice %166 {offsets = [0, 96], sizes = [2, 32], strides = [1, 1]} : vector<2x128xf32> to vector<2x32xf32>
    %177 = arith.mulf %173, %176 : vector<2x32xf32>
    %178 = arith.addf %175, %177 : vector<2x32xf32>
    %179 = math.tanh %178 : vector<2x32xf32>
    %180 = arith.subf %140, %179 : vector<2x32xf32>
    %181 = arith.mulf %174, %180 : vector<2x32xf32>
    %182 = arith.addf %179, %181 : vector<2x32xf32>
    %183 = arith.truncf %160 : vector<2x32xf32> to vector<2x32xbf16>
    %cst_35 = arith.constant dense<0.000000e+00> : vector<2x128xf32>
    %184 = tpu.matmul %183, %0, %cst_35 {dimension_numbers = #tpu.dot_dimension_numbers<[1], [0], [0], [1], [0, 0, 1, 1], [], []>} : vector<2x32xbf16>, vector<32x128xbf16>, vector<2x128xf32> -> vector<2x128xf32>
    %185 = vector.extract_strided_slice %12 {offsets = [8, 0], sizes = [2, 128], strides = [1, 1]} : vector<16x128xf32> to vector<2x128xf32>
    %186 = arith.addf %184, %185 : vector<2x128xf32>
    %187 = vector.extract_strided_slice %186 {offsets = [0, 0], sizes = [2, 64], strides = [1, 1]} : vector<2x128xf32> to vector<2x64xf32>
    %188 = arith.negf %187 : vector<2x64xf32>
    %189 = math.exp %188 : vector<2x64xf32>
    %cst_36 = arith.constant 1.000000e+00 : f32
    %190 = vector.broadcast %cst_36 : f32 to vector<2x64xf32>
    %191 = arith.addf %190, %189 : vector<2x64xf32>
    %192 = arith.divf %190, %191 : vector<2x64xf32>
    %193 = vector.extract_strided_slice %192 {offsets = [0, 0], sizes = [2, 32], strides = [1, 1]} : vector<2x64xf32> to vector<2x32xf32>
    %194 = vector.extract_strided_slice %192 {offsets = [0, 32], sizes = [2, 32], strides = [1, 1]} : vector<2x64xf32> to vector<2x32xf32>
    %195 = vector.extract_strided_slice %186 {offsets = [0, 64], sizes = [2, 32], strides = [1, 1]} : vector<2x128xf32> to vector<2x32xf32>
    %196 = vector.extract_strided_slice %186 {offsets = [0, 96], sizes = [2, 32], strides = [1, 1]} : vector<2x128xf32> to vector<2x32xf32>
    %197 = arith.mulf %193, %196 : vector<2x32xf32>
    %198 = arith.addf %195, %197 : vector<2x32xf32>
    %199 = math.tanh %198 : vector<2x32xf32>
    %200 = arith.subf %160, %199 : vector<2x32xf32>
    %201 = arith.mulf %194, %200 : vector<2x32xf32>
    %202 = arith.addf %199, %201 : vector<2x32xf32>
    %203 = arith.truncf %182 : vector<2x32xf32> to vector<2x32xbf16>
    %cst_37 = arith.constant dense<0.000000e+00> : vector<2x128xf32>
    %204 = tpu.matmul %203, %2, %cst_37 {dimension_numbers = #tpu.dot_dimension_numbers<[1], [0], [0], [1], [0, 0, 1, 1], [], []>} : vector<2x32xbf16>, vector<32x128xbf16>, vector<2x128xf32> -> vector<2x128xf32>
    %205 = arith.truncf %202 : vector<2x32xf32> to vector<2x32xbf16>
    %cst_38 = arith.constant dense<0.000000e+00> : vector<2x128xf32>
    %206 = tpu.matmul %205, %1, %cst_38 {dimension_numbers = #tpu.dot_dimension_numbers<[1], [0], [0], [1], [0, 0, 1, 1], [], []>} : vector<2x32xbf16>, vector<32x128xbf16>, vector<2x128xf32> -> vector<2x128xf32>
    %207 = arith.addf %204, %206 : vector<2x128xf32>
    %208 = arith.addf %207, %5 : vector<2x128xf32>
    %209 = vector.extract_strided_slice %208 {offsets = [0, 0], sizes = [2, 64], strides = [1, 1]} : vector<2x128xf32> to vector<2x64xf32>
    %210 = arith.negf %209 : vector<2x64xf32>
    %211 = math.exp %210 : vector<2x64xf32>
    %cst_39 = arith.constant 1.000000e+00 : f32
    %212 = vector.broadcast %cst_39 : f32 to vector<2x64xf32>
    %213 = arith.addf %212, %211 : vector<2x64xf32>
    %214 = arith.divf %212, %213 : vector<2x64xf32>
    %215 = vector.extract_strided_slice %214 {offsets = [0, 0], sizes = [2, 32], strides = [1, 1]} : vector<2x64xf32> to vector<2x32xf32>
    %216 = vector.extract_strided_slice %214 {offsets = [0, 32], sizes = [2, 32], strides = [1, 1]} : vector<2x64xf32> to vector<2x32xf32>
    %217 = vector.extract_strided_slice %208 {offsets = [0, 64], sizes = [2, 32], strides = [1, 1]} : vector<2x128xf32> to vector<2x32xf32>
    %218 = vector.extract_strided_slice %208 {offsets = [0, 96], sizes = [2, 32], strides = [1, 1]} : vector<2x128xf32> to vector<2x32xf32>
    %219 = arith.mulf %215, %218 : vector<2x32xf32>
    %220 = arith.addf %217, %219 : vector<2x32xf32>
    %221 = math.tanh %220 : vector<2x32xf32>
    %222 = arith.subf %182, %221 : vector<2x32xf32>
    %223 = arith.mulf %216, %222 : vector<2x32xf32>
    %224 = arith.addf %221, %223 : vector<2x32xf32>
    %225 = arith.truncf %202 : vector<2x32xf32> to vector<2x32xbf16>
    %cst_40 = arith.constant dense<0.000000e+00> : vector<2x128xf32>
    %226 = tpu.matmul %225, %0, %cst_40 {dimension_numbers = #tpu.dot_dimension_numbers<[1], [0], [0], [1], [0, 0, 1, 1], [], []>} : vector<2x32xbf16>, vector<32x128xbf16>, vector<2x128xf32> -> vector<2x128xf32>
    %227 = vector.extract_strided_slice %12 {offsets = [10, 0], sizes = [2, 128], strides = [1, 1]} : vector<16x128xf32> to vector<2x128xf32>
    %228 = arith.addf %226, %227 : vector<2x128xf32>
    %229 = vector.extract_strided_slice %228 {offsets = [0, 0], sizes = [2, 64], strides = [1, 1]} : vector<2x128xf32> to vector<2x64xf32>
    %230 = arith.negf %229 : vector<2x64xf32>
    %231 = math.exp %230 : vector<2x64xf32>
    %cst_41 = arith.constant 1.000000e+00 : f32
    %232 = vector.broadcast %cst_41 : f32 to vector<2x64xf32>
    %233 = arith.addf %232, %231 : vector<2x64xf32>
    %234 = arith.divf %232, %233 : vector<2x64xf32>
    %235 = vector.extract_strided_slice %234 {offsets = [0, 0], sizes = [2, 32], strides = [1, 1]} : vector<2x64xf32> to vector<2x32xf32>
    %236 = vector.extract_strided_slice %234 {offsets = [0, 32], sizes = [2, 32], strides = [1, 1]} : vector<2x64xf32> to vector<2x32xf32>
    %237 = vector.extract_strided_slice %228 {offsets = [0, 64], sizes = [2, 32], strides = [1, 1]} : vector<2x128xf32> to vector<2x32xf32>
    %238 = vector.extract_strided_slice %228 {offsets = [0, 96], sizes = [2, 32], strides = [1, 1]} : vector<2x128xf32> to vector<2x32xf32>
    %239 = arith.mulf %235, %238 : vector<2x32xf32>
    %240 = arith.addf %237, %239 : vector<2x32xf32>
    %241 = math.tanh %240 : vector<2x32xf32>
    %242 = arith.subf %202, %241 : vector<2x32xf32>
    %243 = arith.mulf %236, %242 : vector<2x32xf32>
    %244 = arith.addf %241, %243 : vector<2x32xf32>
    %245 = arith.truncf %224 : vector<2x32xf32> to vector<2x32xbf16>
    %cst_42 = arith.constant dense<0.000000e+00> : vector<2x128xf32>
    %246 = tpu.matmul %245, %2, %cst_42 {dimension_numbers = #tpu.dot_dimension_numbers<[1], [0], [0], [1], [0, 0, 1, 1], [], []>} : vector<2x32xbf16>, vector<32x128xbf16>, vector<2x128xf32> -> vector<2x128xf32>
    %247 = arith.truncf %244 : vector<2x32xf32> to vector<2x32xbf16>
    %cst_43 = arith.constant dense<0.000000e+00> : vector<2x128xf32>
    %248 = tpu.matmul %247, %1, %cst_43 {dimension_numbers = #tpu.dot_dimension_numbers<[1], [0], [0], [1], [0, 0, 1, 1], [], []>} : vector<2x32xbf16>, vector<32x128xbf16>, vector<2x128xf32> -> vector<2x128xf32>
    %249 = arith.addf %246, %248 : vector<2x128xf32>
    %250 = arith.addf %249, %5 : vector<2x128xf32>
    %251 = vector.extract_strided_slice %250 {offsets = [0, 0], sizes = [2, 64], strides = [1, 1]} : vector<2x128xf32> to vector<2x64xf32>
    %252 = arith.negf %251 : vector<2x64xf32>
    %253 = math.exp %252 : vector<2x64xf32>
    %cst_44 = arith.constant 1.000000e+00 : f32
    %254 = vector.broadcast %cst_44 : f32 to vector<2x64xf32>
    %255 = arith.addf %254, %253 : vector<2x64xf32>
    %256 = arith.divf %254, %255 : vector<2x64xf32>
    %257 = vector.extract_strided_slice %256 {offsets = [0, 0], sizes = [2, 32], strides = [1, 1]} : vector<2x64xf32> to vector<2x32xf32>
    %258 = vector.extract_strided_slice %256 {offsets = [0, 32], sizes = [2, 32], strides = [1, 1]} : vector<2x64xf32> to vector<2x32xf32>
    %259 = vector.extract_strided_slice %250 {offsets = [0, 64], sizes = [2, 32], strides = [1, 1]} : vector<2x128xf32> to vector<2x32xf32>
    %260 = vector.extract_strided_slice %250 {offsets = [0, 96], sizes = [2, 32], strides = [1, 1]} : vector<2x128xf32> to vector<2x32xf32>
    %261 = arith.mulf %257, %260 : vector<2x32xf32>
    %262 = arith.addf %259, %261 : vector<2x32xf32>
    %263 = math.tanh %262 : vector<2x32xf32>
    %264 = arith.subf %224, %263 : vector<2x32xf32>
    %265 = arith.mulf %258, %264 : vector<2x32xf32>
    %266 = arith.addf %263, %265 : vector<2x32xf32>
    %267 = arith.truncf %244 : vector<2x32xf32> to vector<2x32xbf16>
    %cst_45 = arith.constant dense<0.000000e+00> : vector<2x128xf32>
    %268 = tpu.matmul %267, %0, %cst_45 {dimension_numbers = #tpu.dot_dimension_numbers<[1], [0], [0], [1], [0, 0, 1, 1], [], []>} : vector<2x32xbf16>, vector<32x128xbf16>, vector<2x128xf32> -> vector<2x128xf32>
    %269 = vector.extract_strided_slice %12 {offsets = [12, 0], sizes = [2, 128], strides = [1, 1]} : vector<16x128xf32> to vector<2x128xf32>
    %270 = arith.addf %268, %269 : vector<2x128xf32>
    %271 = vector.extract_strided_slice %270 {offsets = [0, 0], sizes = [2, 64], strides = [1, 1]} : vector<2x128xf32> to vector<2x64xf32>
    %272 = arith.negf %271 : vector<2x64xf32>
    %273 = math.exp %272 : vector<2x64xf32>
    %cst_46 = arith.constant 1.000000e+00 : f32
    %274 = vector.broadcast %cst_46 : f32 to vector<2x64xf32>
    %275 = arith.addf %274, %273 : vector<2x64xf32>
    %276 = arith.divf %274, %275 : vector<2x64xf32>
    %277 = vector.extract_strided_slice %276 {offsets = [0, 0], sizes = [2, 32], strides = [1, 1]} : vector<2x64xf32> to vector<2x32xf32>
    %278 = vector.extract_strided_slice %276 {offsets = [0, 32], sizes = [2, 32], strides = [1, 1]} : vector<2x64xf32> to vector<2x32xf32>
    %279 = vector.extract_strided_slice %270 {offsets = [0, 64], sizes = [2, 32], strides = [1, 1]} : vector<2x128xf32> to vector<2x32xf32>
    %280 = vector.extract_strided_slice %270 {offsets = [0, 96], sizes = [2, 32], strides = [1, 1]} : vector<2x128xf32> to vector<2x32xf32>
    %281 = arith.mulf %277, %280 : vector<2x32xf32>
    %282 = arith.addf %279, %281 : vector<2x32xf32>
    %283 = math.tanh %282 : vector<2x32xf32>
    %284 = arith.subf %244, %283 : vector<2x32xf32>
    %285 = arith.mulf %278, %284 : vector<2x32xf32>
    %286 = arith.addf %283, %285 : vector<2x32xf32>
    %287 = arith.truncf %266 : vector<2x32xf32> to vector<2x32xbf16>
    %cst_47 = arith.constant dense<0.000000e+00> : vector<2x128xf32>
    %288 = tpu.matmul %287, %2, %cst_47 {dimension_numbers = #tpu.dot_dimension_numbers<[1], [0], [0], [1], [0, 0, 1, 1], [], []>} : vector<2x32xbf16>, vector<32x128xbf16>, vector<2x128xf32> -> vector<2x128xf32>
    %289 = arith.truncf %286 : vector<2x32xf32> to vector<2x32xbf16>
    %cst_48 = arith.constant dense<0.000000e+00> : vector<2x128xf32>
    %290 = tpu.matmul %289, %1, %cst_48 {dimension_numbers = #tpu.dot_dimension_numbers<[1], [0], [0], [1], [0, 0, 1, 1], [], []>} : vector<2x32xbf16>, vector<32x128xbf16>, vector<2x128xf32> -> vector<2x128xf32>
    %291 = arith.addf %288, %290 : vector<2x128xf32>
    %292 = arith.addf %291, %5 : vector<2x128xf32>
    %293 = vector.extract_strided_slice %292 {offsets = [0, 0], sizes = [2, 64], strides = [1, 1]} : vector<2x128xf32> to vector<2x64xf32>
    %294 = arith.negf %293 : vector<2x64xf32>
    %295 = math.exp %294 : vector<2x64xf32>
    %cst_49 = arith.constant 1.000000e+00 : f32
    %296 = vector.broadcast %cst_49 : f32 to vector<2x64xf32>
    %297 = arith.addf %296, %295 : vector<2x64xf32>
    %298 = arith.divf %296, %297 : vector<2x64xf32>
    %299 = vector.extract_strided_slice %298 {offsets = [0, 0], sizes = [2, 32], strides = [1, 1]} : vector<2x64xf32> to vector<2x32xf32>
    %300 = vector.extract_strided_slice %298 {offsets = [0, 32], sizes = [2, 32], strides = [1, 1]} : vector<2x64xf32> to vector<2x32xf32>
    %301 = vector.extract_strided_slice %292 {offsets = [0, 64], sizes = [2, 32], strides = [1, 1]} : vector<2x128xf32> to vector<2x32xf32>
    %302 = vector.extract_strided_slice %292 {offsets = [0, 96], sizes = [2, 32], strides = [1, 1]} : vector<2x128xf32> to vector<2x32xf32>
    %303 = arith.mulf %299, %302 : vector<2x32xf32>
    %304 = arith.addf %301, %303 : vector<2x32xf32>
    %305 = math.tanh %304 : vector<2x32xf32>
    %306 = arith.subf %266, %305 : vector<2x32xf32>
    %307 = arith.mulf %300, %306 : vector<2x32xf32>
    %308 = arith.addf %305, %307 : vector<2x32xf32>
    %309 = arith.truncf %286 : vector<2x32xf32> to vector<2x32xbf16>
    %cst_50 = arith.constant dense<0.000000e+00> : vector<2x128xf32>
    %310 = tpu.matmul %309, %0, %cst_50 {dimension_numbers = #tpu.dot_dimension_numbers<[1], [0], [0], [1], [0, 0, 1, 1], [], []>} : vector<2x32xbf16>, vector<32x128xbf16>, vector<2x128xf32> -> vector<2x128xf32>
    %311 = vector.extract_strided_slice %12 {offsets = [14, 0], sizes = [2, 128], strides = [1, 1]} : vector<16x128xf32> to vector<2x128xf32>
    %312 = arith.addf %310, %311 : vector<2x128xf32>
    %313 = vector.extract_strided_slice %312 {offsets = [0, 0], sizes = [2, 64], strides = [1, 1]} : vector<2x128xf32> to vector<2x64xf32>
    %314 = arith.negf %313 : vector<2x64xf32>
    %315 = math.exp %314 : vector<2x64xf32>
    %cst_51 = arith.constant 1.000000e+00 : f32
    %316 = vector.broadcast %cst_51 : f32 to vector<2x64xf32>
    %317 = arith.addf %316, %315 : vector<2x64xf32>
    %318 = arith.divf %316, %317 : vector<2x64xf32>
    %319 = vector.extract_strided_slice %318 {offsets = [0, 0], sizes = [2, 32], strides = [1, 1]} : vector<2x64xf32> to vector<2x32xf32>
    %320 = vector.extract_strided_slice %318 {offsets = [0, 32], sizes = [2, 32], strides = [1, 1]} : vector<2x64xf32> to vector<2x32xf32>
    %321 = vector.extract_strided_slice %312 {offsets = [0, 64], sizes = [2, 32], strides = [1, 1]} : vector<2x128xf32> to vector<2x32xf32>
    %322 = vector.extract_strided_slice %312 {offsets = [0, 96], sizes = [2, 32], strides = [1, 1]} : vector<2x128xf32> to vector<2x32xf32>
    %323 = arith.mulf %319, %322 : vector<2x32xf32>
    %324 = arith.addf %321, %323 : vector<2x32xf32>
    %325 = math.tanh %324 : vector<2x32xf32>
    %326 = arith.subf %286, %325 : vector<2x32xf32>
    %327 = arith.mulf %320, %326 : vector<2x32xf32>
    %328 = arith.addf %325, %327 : vector<2x32xf32>
    %329 = arith.truncf %308 : vector<2x32xf32> to vector<2x32xbf16>
    %cst_52 = arith.constant dense<0.000000e+00> : vector<2x128xf32>
    %330 = tpu.matmul %329, %2, %cst_52 {dimension_numbers = #tpu.dot_dimension_numbers<[1], [0], [0], [1], [0, 0, 1, 1], [], []>} : vector<2x32xbf16>, vector<32x128xbf16>, vector<2x128xf32> -> vector<2x128xf32>
    %331 = arith.truncf %328 : vector<2x32xf32> to vector<2x32xbf16>
    %cst_53 = arith.constant dense<0.000000e+00> : vector<2x128xf32>
    %332 = tpu.matmul %331, %1, %cst_53 {dimension_numbers = #tpu.dot_dimension_numbers<[1], [0], [0], [1], [0, 0, 1, 1], [], []>} : vector<2x32xbf16>, vector<32x128xbf16>, vector<2x128xf32> -> vector<2x128xf32>
    %333 = arith.addf %330, %332 : vector<2x128xf32>
    %334 = arith.addf %333, %5 : vector<2x128xf32>
    %335 = vector.extract_strided_slice %334 {offsets = [0, 0], sizes = [2, 64], strides = [1, 1]} : vector<2x128xf32> to vector<2x64xf32>
    %336 = arith.negf %335 : vector<2x64xf32>
    %337 = math.exp %336 : vector<2x64xf32>
    %cst_54 = arith.constant 1.000000e+00 : f32
    %338 = vector.broadcast %cst_54 : f32 to vector<2x64xf32>
    %339 = arith.addf %338, %337 : vector<2x64xf32>
    %340 = arith.divf %338, %339 : vector<2x64xf32>
    %341 = vector.extract_strided_slice %340 {offsets = [0, 0], sizes = [2, 32], strides = [1, 1]} : vector<2x64xf32> to vector<2x32xf32>
    %342 = vector.extract_strided_slice %340 {offsets = [0, 32], sizes = [2, 32], strides = [1, 1]} : vector<2x64xf32> to vector<2x32xf32>
    %343 = vector.extract_strided_slice %334 {offsets = [0, 64], sizes = [2, 32], strides = [1, 1]} : vector<2x128xf32> to vector<2x32xf32>
    %344 = vector.extract_strided_slice %334 {offsets = [0, 96], sizes = [2, 32], strides = [1, 1]} : vector<2x128xf32> to vector<2x32xf32>
    %345 = arith.mulf %341, %344 : vector<2x32xf32>
    %346 = arith.addf %343, %345 : vector<2x32xf32>
    %347 = math.tanh %346 : vector<2x32xf32>
    %348 = arith.subf %308, %347 : vector<2x32xf32>
    %349 = arith.mulf %342, %348 : vector<2x32xf32>
    %350 = arith.addf %347, %349 : vector<2x32xf32>
    %c0_55 = arith.constant 0 : index
    %c0_56 = arith.constant 0 : index
    %351 = vector.load %arg8[%c0_55, %c0_56] : memref<32x4xf32, #tpu.memory_space<vmem>>, vector<32x4xf32>
    %cst_57 = arith.constant dense<0.000000e+00> : vector<2x4xf32>
    %352 = tpu.matmul %350, %351, %cst_57 {dimension_numbers = #tpu.dot_dimension_numbers<[1], [0], [0], [1], [0, 0, 1, 1], [], []>} : vector<2x32xf32>, vector<32x4xf32>, vector<2x4xf32> -> vector<2x4xf32>
    %c0_58 = arith.constant 0 : index
    %c0_59 = arith.constant 0 : index
    %353 = vector.load %arg9[%c0_58, %c0_59] : memref<1x4xf32, #tpu.memory_space<vmem>>, vector<1x4xf32>
    %354 = vector.broadcast %353 : vector<1x4xf32> to vector<2x4xf32>
    %355 = arith.addf %352, %354 : vector<2x4xf32>
    %c0_60 = arith.constant 0 : index
    %c0_61 = arith.constant 0 : index
    %356 = vector.load %arg10[%c0_60, %c0_61] : memref<2x4xf32, #tpu.memory_space<vmem>>, vector<2x4xf32>
    tpu.vector_store %arg10[%c0_60, %c0_61], %355 {strides = array<i32>} : memref<2x4xf32, #tpu.memory_space<vmem>>, vector<2x4xf32>,
    return
  }
  func.func @transform_0(%arg0: i32) -> (i32, i32) {
    %c0_i32 = arith.constant 0 : i32
    %c0_i32_0 = arith.constant 0 : i32
    %c0_i32_1 = arith.constant 0 : i32
    return %c0_i32, %c0_i32_0 : i32, i32
  }
  func.func @transform_1(%arg0: i32) -> (i32, i32) {
    %c0_i32 = arith.constant 0 : i32
    %c0_i32_0 = arith.constant 0 : i32
    %c0_i32_1 = arith.constant 0 : i32
    return %c0_i32, %c0_i32_0 : i32, i32
  }
  func.func @transform_2(%arg0: i32) -> (i32, i32) {
    %c0_i32 = arith.constant 0 : i32
    %c0_i32_0 = arith.constant 0 : i32
    %c0_i32_1 = arith.constant 0 : i32
    return %c0_i32, %c0_i32_0 : i32, i32
  }
  func.func @transform_3(%arg0: i32) -> (i32, i32) {
    %c0_i32 = arith.constant 0 : i32
    %c0_i32_0 = arith.constant 0 : i32
    %c0_i32_1 = arith.constant 0 : i32
    return %c0_i32, %c0_i32_0 : i32, i32
  }
  func.func @transform_4(%arg0: i32) -> (i32, i32) {
    %c0_i32 = arith.constant 0 : i32
    %c0_i32_0 = arith.constant 0 : i32
    %c0_i32_1 = arith.constant 0 : i32
    return %c0_i32, %c0_i32_0 : i32, i32
  }
  func.func @transform_5(%arg0: i32) -> (i32, i32) {
    %c0_i32 = arith.constant 0 : i32
    %c0_i32_0 = arith.constant 0 : i32
    %c0_i32_1 = arith.constant 0 : i32
    return %c0_i32, %c0_i32_0 : i32, i32
  }
  func.func @transform_6(%arg0: i32) -> (i32, i32) {
    %c0_i32 = arith.constant 0 : i32
    %c0_i32_0 = arith.constant 0 : i32
    %c0_i32_1 = arith.constant 0 : i32
    return %c0_i32, %c0_i32_0 : i32, i32
  }
  func.func @transform_7(%arg0: i32) -> (i32, i32) {
    %c0_i32 = arith.constant 0 : i32
    %c0_i32_0 = arith.constant 0 : i32
    %c0_i32_1 = arith.constant 0 : i32
    return %c0_i32, %c0_i32_0 : i32, i32
  }
  func.func @transform_8(%arg0: i32) -> (i32, i32) {
    %c0_i32 = arith.constant 0 : i32
    %c0_i32_0 = arith.constant 0 : i32
    %c0_i32_1 = arith.constant 0 : i32
    return %c0_i32, %c0_i32_0 : i32, i32
  }
  func.func @transform_9(%arg0: i32) -> (i32, i32) {
    %c0_i32 = arith.constant 0 : i32
    %c0_i32_0 = arith.constant 0 : i32
    %c0_i32_1 = arith.constant 0 : i32
    return %c0_i32, %c0_i32_0 : i32, i32
  }
}

</mosaic_0001>

<bundles_post_ra>
// kernel: rnn_model_forward.1
= control target key start
LH: loop header
LB: loop body
LE: loop exit
PB: predicated region body
PF: predicated region fallthrough
CT: control target
= control target key end

     0   :  { %vm68_vm0 = vcmask 1042432   ;;  %v2265_v1 = vmov 0.0   ;;  %vm2266_vm1 = vmmov 0   ;;  %vm64_vm2 = vcmask 48128   ;;  %s2742_s0 = inlined_call_operand.vmem [shape: f32[16,6], index: 0, kind: input, shape index: {}]   ;;  %s2743_s1 = inlined_call_operand.vmem [shape: bf16[6,128], index: 1, kind: input, shape index: {}]   ;;  %s2744_s2 = inlined_call_operand.vmem [shape: bf16[32,128], index: 2, kind: input, shape index: {}]   ;;  %s2745_s3 = inlined_call_operand.vmem [shape: f32[1,128], index: 3, kind: input, shape index: {}]   ;;  %s2746_s4 = inlined_call_operand.vmem [shape: bf16[32,128], index: 4, kind: input, shape index: {}]   ;;  %s2747_s5 = inlined_call_operand.vmem [shape: bf16[32,128], index: 5, kind: input, shape index: {}]   ;;  %s2748_s6 = inlined_call_operand.vmem [shape: f32[1,128], index: 6, kind: input, shape index: {}]   ;;  %s2749_s7 = inlined_call_operand.vmem [shape: f32[32,4], index: 7, kind: input, shape index: {}]   ;;  %s2750_s8 = inlined_call_operand.vmem [shape: f32[1,4], index: 8, kind: input, shape index: {}]   ;;  %s2751_s9 = inlined_call_operand.hbm [shape: f32[2,4], index: 9, kind: output, shape index: {}]  }
   0x1   :  { %v56_v0 = vld [vmem:[%s2743_s1] sm:$0x7]  ;;  %1918 = vmatprep.subr.bf16.mxu0 %v2265_v1  ;;  %1924 = vmatprep.subr.bf16.mxu1 %v2265_v1  ;;  %v2330_v3 = vld [vmem:[%s2744_s2 + $0x8] sm:$0xff]  }
   0x2   :  { %v70_v2 = vsel %vm68_vm0, %v56_v0, 0  ;;  %v53_v4 = vld [vmem:[%s2742_s0] sm:$0xff]  ;;  %1920 = vmatprep.mubr.msk.bf16.mxu0 %vm2266_vm1, %v2265_v1  ;;  %v54_v5 = vld [vmem:[%s2742_s0 + $0x8] sm:$0xff]  ;;  %1925 = vmatpush3.bf16.msra.mxu1 %v2330_v3 }
   0x3   :  { %1919 = vmatpush3.bf16.msra.mxu0 %v70_v2  ;;  %v55_v6 = vpack.c.bf16 %v54_v5, %v53_v4  ;;  %v2344_v7 = vld [vmem:[%s2744_s2] sm:$0xff]   ;;  %1928 = vmatprep.mubr.msk.bf16.mxu1 %vm2266_vm1, %v2265_v1 }
   0x4   :  { %1926 = vmatprep.subr.bf16.mxu1 %v2265_v1  ;;  %1932 = vmatprep.subr.bf16.mxu0 %v2265_v1 }
   0x6   :  { %1921 = vmatmul.mubr.msk.bf16.vlgmr.msra.gmra.mxu0 %vm64_vm2, %v55_v6 }
   0x7   :  { %1936 = vmatprep.mubr.msk.bf16.mxu0 %vm2266_vm1, %v2265_v1 }
   0x8   :  { %14 = vsyncpa [#allocation3], 0  ;;  %1927 = vmatpush3.bf16.msra.mxu1 %v2344_v7  ;;  %v2267_v8 = vmov 0   ;;  %v1791_v9 = vld [vmem:[%s2745_s3] ss:$0 sm:$0xff]  ;;  %s2268_s19 = smov 32  }
   0x9   :  { %1940 = vmatprep.subr.bf16.mxu1 %v2265_v1  ;;  %s2269_s3 = smov 64   ;;  %s2270_s20 = smov 96   ;;  %v2370_v31 = vld [vmem:[%s2746_s4 + $0x8] sm:$0xff]   ;;  %v2382_v33 = vld [vmem:[%s2746_s4] sm:$0xff]   ;;  %vm125_vm3 = vcmask 261120   ;;  %vm1774_vm4 = vcmask 25600  }
   0xa   :  { %v2375_v32 = vld [vmem:[%s2747_s5 + $0x8] sm:$0xff]   ;;  %1933 = vmatpush3.bf16.msra.mxu0 %v2370_v31  ;;  %v2387_v34 = vld [vmem:[%s2747_s5] sm:$0xff]  }
   0xb   :  { %1929 = vmatmul.mubr.bf16.vlgmr.msra.gmra.mxu1 %v2267_v8  ;;  %1934 = vmatprep.subr.bf16.mxu0 %v2265_v1  ;;  %v2424_v46 = vld [vmem:[%s2748_s6] ss:$0 sm:$0xff] }
   0xc   :  { %1944 = vmatprep.mubr.msk.bf16.mxu1 %vm2266_vm1, %v2265_v1  ;;  %1941 = vmatpush3.bf16.msra.mxu1 %v2375_v32 }
   0xd   :  { %1942 = vmatprep.subr.bf16.mxu1 %v2265_v1 }
   0xe   :  { %1935 = vmatpush3.bf16.msra.mxu0 %v2382_v33 }
   0xf   :  { %1948 = vmatprep.subr.bf16.mxu0 %v2265_v1 }
  0x10   :  { %1943 = vmatpush3.bf16.msra.mxu1 %v2387_v34 }
  0x11   :  { %1956 = vmatprep.subr.bf16.mxu1 %v2265_v1 }
  0x13   :  { %1945 = vmatmul.mubr.bf16.vlgmr.msra.gmra.mxu1 %v2267_v8 }
  0x14   :  { %1957 = vmatpush3.bf16.msra.mxu1 %v2370_v31  ;;  %1960 = vmatprep.mubr.msk.bf16.mxu1 %vm2266_vm1, %v2265_v1 }
  0x15   :  { %1958 = vmatprep.subr.bf16.mxu1 %v2265_v1 }
  0x18   :  { %1959 = vmatpush3.bf16.msra.mxu1 %v2382_v33 }
  0x19   :  { %1972 = vmatprep.subr.bf16.mxu1 %v2265_v1 }
  0xc6   :  { %v106_v10 = vpop.f32.mrf.mxu0 }
  0xc7   :  { %v2359_v11 = vadd.f32 %v1791_v9, %v106_v10 }
  0xc8   :  { %v1922_v12 = vpop.f32.mrf.mxu0 }
  0xc9   :  { %v338_v52 = vrot.slane %v2359_v11, 2 }
  0xca   :  { %v109_v13 = vpop.f32.mrf.mxu0 }
  0xcb   :  { %v2361_v14 = vadd.f32 %v1791_v9, %v109_v13  ;;  %v163_v15 = vpop.f32.mrf.mxu1 }
  0xcc   :  { %v164_v16 = vadd.f32 %v163_v15, %v2359_v11  ;;  %v1923_v17 = vpop.f32.mrf.mxu0 }
  0xcd   :  { %v1930_v18 = vpop.f32.mrf.mxu1 }
  0xce   :  { %176 = vrot.lane.b32.xlu0 %v164_v16, %s2268_s19  ;;  %v1795_v21 = vmul.f32 -1.442695, %v164_v16 }
  0xcf   :  { %v166_v19 = vpop.f32.mrf.mxu1 }
  0xd0   :  { %2140 = vpow2.f32 %v1795_v21 }
  0xd1   :  { %v1931_v20 = vpop.f32.mrf.mxu1 }
  0xd3   :  { %v302_v41 = vpop.f32.mrf.mxu1 }
  0xd5   :  { %v1946_v42 = vpop.f32.mrf.mxu1 }
  0xd7   :  { %v305_v43 = vpop.f32.mrf.mxu1 }
  0xd9   :  { %v1947_v44 = vpop.f32.mrf.mxu1 }
  0xdd   :  { %v2141_v22 = vpop.eup %2140 }
  0xde   :  { %v172_v23 = vadd.f32 1.0, %v2141_v22 }
  0xe0   :  { %2142 = vrcp.f32 %v172_v23 }
  0xed   :  { %v2143_v24 = vpop.eup %2142 }
 0x140   :  { %v177_v25 = vpop.permute.xlu0 %176 }
 0x141   :  { %v179_v26 = vmul.f32 %v2143_v24, %v177_v25 }
 0x143   :  { %181 = vrot.lane.b32.xlu0 %v179_v26, %s2269_s3 }
 0x1b5   :  { %v182_v27 = vpop.permute.xlu0 %181 }
 0x1b6   :  { %v184_v28 = vadd.f32 %v182_v27, %v164_v16 }
 0x1b8   :  { %2144 = vtanh.f32 %v184_v28 }
 0x1c5   :  { %v2145_v29 = vpop.eup %2144 }
 0x1c6   :  { %v186_v30 = vsub.f32 0.0, %v2145_v29 }
 0x1c8   :  { %188 = vrot.lane.b32.xlu1 %v186_v30, %s2270_s20 }
 0x23a   :  { %v189_v35 = vpop.permute.xlu1 %188 }
 0x23b   :  { %v191_v36 = vmul.f32 %v2143_v24, %v189_v35 }
 0x23d   :  { %193 = vrot.lane.b32.xlu1 %v191_v36, %s2268_s19 }
 0x2af   :  { %v194_v37 = vpop.permute.xlu1 %193 }
 0x2b0   :  { %v2402_v38 = vadd.f32 %v2145_v29, %v194_v37 }
 0x2b2   :  { %v197_v39 = vpack.c.bf16 %v2402_v38, %v2402_v38 }
 0x2b4   :  { %199 = vrot.lane.b32.xlu0 %v197_v39, %s2269_s3 }
 0x326   :  { %v200_v40 = vpop.permute.xlu0 %199 }
 0x327   :  { %1937 = vmatmul.mubr.msk.bf16.vlgmr.msra.gmra.mxu0 %vm125_vm3, %v200_v40 }
 0x328   :  { %1949 = vmatpush3.bf16.msra.mxu0 %v2330_v3  ;;  %1952 = vmatprep.mubr.msk.bf16.mxu0 %vm2266_vm1, %v2265_v1 }
 0x329   :  { %1950 = vmatprep.subr.bf16.mxu0 %v2265_v1 }
 0x32c   :  { %1951 = vmatpush3.bf16.msra.mxu0 %v2344_v7 }
 0x32d   :  { %1964 = vmatprep.subr.bf16.mxu0 %v2265_v1 }
 0x32f   :  { %1953 = vmatmul.mubr.msk.bf16.vlgmr.msra.gmra.mxu0 %vm125_vm3, %v200_v40 }
 0x330   :  { %1965 = vmatpush3.bf16.msra.mxu0 %v2375_v32  ;;  %1968 = vmatprep.mubr.msk.bf16.mxu0 %vm2266_vm1, %v2265_v1 }
 0x331   :  { %1966 = vmatprep.subr.bf16.mxu0 %v2265_v1 }
 0x334   :  { %1967 = vmatpush3.bf16.msra.mxu0 %v2387_v34 }
 0x335   :  { %1980 = vmatprep.subr.bf16.mxu0 %v2265_v1 }
 0x3e7   :  { %v250_v45 = vpop.f32.mrf.mxu0 }
 0x3e8   :  { %v303_v47 = vadd.f32 %v302_v41, %v250_v45  ;;  %v531_v45 = vrot.slane %v2359_v11, 4 }
 0x3e9   :  { %v1938_v48 = vpop.f32.mrf.mxu0 }
 0x3ea   :  { %v308_v49 = vadd.f32 %v2424_v46, %v303_v47 }
 0x3eb   :  { %v253_v50 = vpop.f32.mrf.mxu0 }
 0x3ec   :  { %316 = vrot.lane.b32.xlu0 %v308_v49, %s2268_s19  ;;  %v1801_v58 = vmul.f32 -1.442695, %v308_v49 }
 0x3ed   :  { %v1939_v51 = vpop.f32.mrf.mxu0 }
 0x3ee   :  { %2146 = vpow2.f32 %v1801_v58 }
 0x3ef   :  { %v374_v53 = vpop.f32.mrf.mxu0 }
 0x3f0   :  { %v375_v54 = vadd.f32 %v374_v53, %v338_v52 }
 0x3f1   :  { %v1954_v55 = vpop.f32.mrf.mxu0 }
 0x3f2   :  { %387 = vrot.lane.b32.xlu1 %v375_v54, %s2268_s19  ;;  %v1803_v59 = vmul.f32 -1.442695, %v375_v54 }
 0x3f3   :  { %v377_v56 = vpop.f32.mrf.mxu0 }
 0x3f4   :  { %2148 = vpow2.f32 %v1803_v59 }
 0x3f5   :  { %v1955_v57 = vpop.f32.mrf.mxu0 }
 0x3fb   :  { %v2147_v60 = vpop.eup %2146 }
 0x3fc   :  { %v312_v61 = vadd.f32 1.0, %v2147_v60 }
 0x3fe   :  { %2150 = vrcp.f32 %v312_v61 }
 0x401   :  { %v2149_v62 = vpop.eup %2148 }
 0x402   :  { %v383_v63 = vadd.f32 1.0, %v2149_v62 }
 0x404   :  { %2152 = vrcp.f32 %v383_v63 }
 0x40b   :  { %v2151_v0 = vpop.eup %2150 }
 0x411   :  { %v2153_v5 = vpop.eup %2152 }
 0x45e   :  { %v317_v2 = vpop.permute.xlu0 %316 }
 0x45f   :  { %v319_v4 = vmul.f32 %v2151_v0, %v317_v2 }
 0x461   :  { %321 = vrot.lane.b32.xlu0 %v319_v4, %s2269_s3 }
 0x464   :  { %v388_v6 = vpop.permute.xlu1 %387 }
 0x465   :  { %v390_v8 = vmul.f32 %v2153_v5, %v388_v6 }
 0x467   :  { %392 = vrot.lane.b32.xlu1 %v390_v8, %s2269_s3 }
 0x4d3   :  { %v322_v9 = vpop.permute.xlu0 %321 }
 0x4d4   :  { %v324_v10 = vadd.f32 %v322_v9, %v308_v49 }
 0x4d6   :  { %2154 = vtanh.f32 %v324_v10 }
 0x4d9   :  { %v393_v12 = vpop.permute.xlu1 %392 }
 0x4da   :  { %v395_v13 = vadd.f32 %v393_v12, %v375_v54 }
 0x4dc   :  { %2156 = vtanh.f32 %v395_v13 }
 0x4e3   :  { %v2155_v15 = vpop.eup %2154 }
 0x4e4   :  { %v326_v16 = vsub.f32 0.0, %v2155_v15 }
 0x4e6   :  { %328 = vrot.lane.b32.xlu0 %v326_v16, %s2270_s20 }
 0x4e9   :  { %v2157_v17 = vpop.eup %2156 }
 0x4ea   :  { %v397_v18 = vsub.f32 %v2402_v38, %v2157_v17 }
 0x4ec   :  { %399 = vrot.lane.b32.xlu1 %v397_v18, %s2270_s20 }
 0x558   :  { %v329_v19 = vpop.permute.xlu0 %328 }
 0x559   :  { %v331_v20 = vmul.f32 %v2151_v0, %v329_v19 }
 0x55b   :  { %333 = vrot.lane.b32.xlu0 %v331_v20, %s2268_s19 }
 0x55e   :  { %v400_v21 = vpop.permute.xlu1 %399 }
 0x55f   :  { %v402_v22 = vmul.f32 %v2153_v5, %v400_v21 }
 0x561   :  { %404 = vrot.lane.b32.xlu1 %v402_v22, %s2268_s19 }
 0x5cd   :  { %v334_v23 = vpop.permute.xlu0 %333 }
 0x5ce   :  { %v2437_v24 = vadd.f32 %v2155_v15, %v334_v23 }
 0x5d0   :  { %v408_v25 = vpack.c.bf16 %v2437_v24, %v2437_v24 }
 0x5d2   :  { %457 = vrot.lane.b32.xlu0 %v408_v25, %s2269_s3 }
 0x5d3   :  { %v405_v26 = vpop.permute.xlu1 %404 }
 0x5d4   :  { %v2442_v27 = vadd.f32 %v2157_v17, %v405_v26 }
 0x5d6   :  { %v409_v28 = vpack.c.bf16 %v2442_v27, %v2442_v27 }
 0x5d8   :  { %411 = vrot.lane.b32.xlu1 %v409_v28, %s2269_s3 }
 0x644   :  { %v458_v29 = vpop.permute.xlu0 %457 }
 0x645   :  { %1969 = vmatmul.mubr.msk.bf16.vlgmr.msra.gmra.mxu0 %vm125_vm3, %v458_v29 }
 0x646   :  { %1981 = vmatpush3.bf16.msra.mxu0 %v2370_v31  ;;  %1984 = vmatprep.mubr.msk.bf16.mxu0 %vm2266_vm1, %v2265_v1 }
 0x647   :  { %1982 = vmatprep.subr.bf16.mxu0 %v2265_v1 }
 0x64a   :  { %v412_v30 = vpop.permute.xlu1 %411  ;;  %1983 = vmatpush3.bf16.msra.mxu0 %v2382_v33 }
 0x64b   :  { %1961 = vmatmul.mubr.msk.bf16.vlgmr.msra.gmra.mxu1 %vm125_vm3, %v412_v30  ;;  %1996 = vmatprep.subr.bf16.mxu0 %v2265_v1 }
 0x64c   :  { %1973 = vmatpush3.bf16.msra.mxu1 %v2330_v3  ;;  %1976 = vmatprep.mubr.msk.bf16.mxu1 %vm2266_vm1, %v2265_v1 }
 0x64d   :  { %1974 = vmatprep.subr.bf16.mxu1 %v2265_v1 }
 0x650   :  { %1975 = vmatpush3.bf16.msra.mxu1 %v2344_v7 }
 0x651   :  { %1988 = vmatprep.subr.bf16.mxu1 %v2265_v1 }
 0x653   :  { %1977 = vmatmul.mubr.msk.bf16.vlgmr.msra.gmra.mxu1 %vm125_vm3, %v412_v30 }
 0x654   :  { %1989 = vmatpush3.bf16.msra.mxu1 %v2375_v32  ;;  %1992 = vmatprep.mubr.msk.bf16.mxu1 %vm2266_vm1, %v2265_v1 }
 0x655   :  { %1990 = vmatprep.subr.bf16.mxu1 %v2265_v1 }
 0x658   :  { %1991 = vmatpush3.bf16.msra.mxu1 %v2387_v34 }
 0x659   :  { %2004 = vmatprep.subr.bf16.mxu1 %v2265_v1 }
 0x705   :  { %v496_v35 = vpop.f32.mrf.mxu0 }
 0x707   :  { %v1970_v36 = vpop.f32.mrf.mxu0 }
 0x709   :  { %v499_v37 = vpop.f32.mrf.mxu0 }
 0x70b   :  { %v450_v38 = vpop.f32.mrf.mxu1  ;;  %v1971_v39 = vpop.f32.mrf.mxu0 }
 0x70c   :  { %v497_v40 = vadd.f32 %v496_v35, %v450_v38  ;;  %v724_v39 = vrot.slane %v2359_v11, 6 }
 0x70d   :  { %v1962_v41 = vpop.f32.mrf.mxu1 }
 0x70e   :  { %v502_v42 = vadd.f32 %v2424_v46, %v497_v40 }
 0x70f   :  { %v453_v43 = vpop.f32.mrf.mxu1 }
 0x710   :  { %510 = vrot.lane.b32.xlu0 %v502_v42, %s2268_s19  ;;  %v1806_v52 = vmul.f32 -1.442695, %v502_v42 }
 0x711   :  { %v1963_v44 = vpop.f32.mrf.mxu1 }
 0x712   :  { %2158 = vpow2.f32 %v1806_v52 }
 0x713   :  { %v567_v47 = vpop.f32.mrf.mxu1 }
 0x714   :  { %v568_v48 = vadd.f32 %v567_v47, %v531_v45 }
 0x715   :  { %v1978_v49 = vpop.f32.mrf.mxu1 }
 0x716   :  { %580 = vrot.lane.b32.xlu1 %v568_v48, %s2268_s19  ;;  %v1808_v53 = vmul.f32 -1.442695, %v568_v48 }
 0x717   :  { %v570_v50 = vpop.f32.mrf.mxu1 }
 0x718   :  { %2160 = vpow2.f32 %v1808_v53 }
 0x719   :  { %v1979_v51 = vpop.f32.mrf.mxu1 }
 0x71f   :  { %v2159_v54 = vpop.eup %2158 }
 0x720   :  { %v506_v55 = vadd.f32 1.0, %v2159_v54 }
 0x722   :  { %2162 = vrcp.f32 %v506_v55 }
 0x725   :  { %v2161_v56 = vpop.eup %2160 }
 0x726   :  { %v576_v57 = vadd.f32 1.0, %v2161_v56 }
 0x728   :  { %2164 = vrcp.f32 %v576_v57 }
 0x72f   :  { %v2163_v58 = vpop.eup %2162 }
 0x735   :  { %v2165_v61 = vpop.eup %2164 }
 0x782   :  { %v511_v59 = vpop.permute.xlu0 %510 }
 0x783   :  { %v513_v60 = vmul.f32 %v2163_v58, %v511_v59 }
 0x785   :  { %515 = vrot.lane.b32.xlu0 %v513_v60, %s2269_s3 }
 0x788   :  { %v581_v62 = vpop.permute.xlu1 %580 }
 0x789   :  { %v583_v63 = vmul.f32 %v2165_v61, %v581_v62 }
 0x78b   :  { %585 = vrot.lane.b32.xlu1 %v583_v63, %s2269_s3 }
 0x7f7   :  { %v516_v0 = vpop.permute.xlu0 %515 }
 0x7f8   :  { %v518_v2 = vadd.f32 %v516_v0, %v502_v42 }
 0x7fa   :  { %2166 = vtanh.f32 %v518_v2 }
 0x7fd   :  { %v586_v4 = vpop.permute.xlu1 %585 }
 0x7fe   :  { %v588_v5 = vadd.f32 %v586_v4, %v568_v48 }
 0x800   :  { %2168 = vtanh.f32 %v588_v5 }
 0x807   :  { %v2167_v6 = vpop.eup %2166 }
 0x808   :  { %v520_v8 = vsub.f32 %v2437_v24, %v2167_v6 }
 0x80a   :  { %522 = vrot.lane.b32.xlu0 %v520_v8, %s2270_s20 }
 0x80d   :  { %v2169_v9 = vpop.eup %2168 }
 0x80e   :  { %v590_v10 = vsub.f32 %v2442_v27, %v2169_v9 }
 0x810   :  { %592 = vrot.lane.b32.xlu1 %v590_v10, %s2270_s20 }
 0x87c   :  { %v523_v12 = vpop.permute.xlu0 %522 }
 0x87d   :  { %v525_v13 = vmul.f32 %v2163_v58, %v523_v12 }
 0x87f   :  { %527 = vrot.lane.b32.xlu0 %v525_v13, %s2268_s19 }
 0x882   :  { %v593_v15 = vpop.permute.xlu1 %592 }
 0x883   :  { %v595_v16 = vmul.f32 %v2165_v61, %v593_v15 }
 0x885   :  { %597 = vrot.lane.b32.xlu1 %v595_v16, %s2268_s19 }
 0x8f1   :  { %v528_v17 = vpop.permute.xlu0 %527 }
 0x8f2   :  { %v2480_v18 = vadd.f32 %v2167_v6, %v528_v17 }
 0x8f4   :  { %v601_v19 = vpack.c.bf16 %v2480_v18, %v2480_v18 }
 0x8f6   :  { %650 = vrot.lane.b32.xlu0 %v601_v19, %s2269_s3 }
 0x8f7   :  { %v598_v20 = vpop.permute.xlu1 %597 }
 0x8f8   :  { %v2485_v21 = vadd.f32 %v2169_v9, %v598_v20 }
 0x8fa   :  { %v602_v22 = vpack.c.bf16 %v2485_v21, %v2485_v21 }
 0x8fc   :  { %604 = vrot.lane.b32.xlu1 %v602_v22, %s2269_s3 }
 0x968   :  { %v651_v23 = vpop.permute.xlu0 %650 }
 0x969   :  { %1993 = vmatmul.mubr.msk.bf16.vlgmr.msra.gmra.mxu1 %vm125_vm3, %v651_v23 }
 0x96a   :  { %2005 = vmatpush3.bf16.msra.mxu1 %v2370_v31  ;;  %2008 = vmatprep.mubr.msk.bf16.mxu1 %vm2266_vm1, %v2265_v1 }
 0x96b   :  { %2006 = vmatprep.subr.bf16.mxu1 %v2265_v1 }
 0x96e   :  { %v605_v24 = vpop.permute.xlu1 %604  ;;  %2007 = vmatpush3.bf16.msra.mxu1 %v2382_v33 }
 0x96f   :  { %1985 = vmatmul.mubr.msk.bf16.vlgmr.msra.gmra.mxu0 %vm125_vm3, %v605_v24  ;;  %2020 = vmatprep.subr.bf16.mxu1 %v2265_v1 }
 0x970   :  { %1997 = vmatpush3.bf16.msra.mxu0 %v2330_v3  ;;  %2000 = vmatprep.mubr.msk.bf16.mxu0 %vm2266_vm1, %v2265_v1 }
 0x971   :  { %1998 = vmatprep.subr.bf16.mxu0 %v2265_v1 }
 0x974   :  { %1999 = vmatpush3.bf16.msra.mxu0 %v2344_v7 }
 0x975   :  { %2012 = vmatprep.subr.bf16.mxu0 %v2265_v1 }
 0x977   :  { %2001 = vmatmul.mubr.msk.bf16.vlgmr.msra.gmra.mxu0 %vm125_vm3, %v605_v24 }
 0x978   :  { %2013 = vmatpush3.bf16.msra.mxu0 %v2375_v32  ;;  %2016 = vmatprep.mubr.msk.bf16.mxu0 %vm2266_vm1, %v2265_v1 }
 0x979   :  { %2014 = vmatprep.subr.bf16.mxu0 %v2265_v1 }
 0x97c   :  { %2015 = vmatpush3.bf16.msra.mxu0 %v2387_v34 }
 0x97d   :  { %2028 = vmatprep.subr.bf16.mxu0 %v2265_v1 }
 0xa29   :  { %v689_v25 = vpop.f32.mrf.mxu1 }
 0xa2b   :  { %v1994_v26 = vpop.f32.mrf.mxu1 }
 0xa2d   :  { %v692_v27 = vpop.f32.mrf.mxu1 }
 0xa2f   :  { %v643_v28 = vpop.f32.mrf.mxu0  ;;  %v1995_v29 = vpop.f32.mrf.mxu1 }
 0xa30   :  { %v690_v30 = vadd.f32 %v689_v25, %v643_v28 }
 0xa31   :  { %v1986_v35 = vpop.f32.mrf.mxu0 }
 0xa32   :  { %v695_v36 = vadd.f32 %v2424_v46, %v690_v30 }
 0xa33   :  { %v646_v37 = vpop.f32.mrf.mxu0 }
 0xa34   :  { %703 = vrot.lane.b32.xlu0 %v695_v36, %s2268_s19  ;;  %v1811_v45 = vmul.f32 -1.442695, %v695_v36 }
 0xa35   :  { %v1987_v38 = vpop.f32.mrf.mxu0 }
 0xa36   :  { %2170 = vpow2.f32 %v1811_v45 }
 0xa37   :  { %v760_v40 = vpop.f32.mrf.mxu0 }
 0xa38   :  { %v761_v41 = vadd.f32 %v760_v40, %v724_v39 }
 0xa39   :  { %v2002_v42 = vpop.f32.mrf.mxu0 }
 0xa3a   :  { %773 = vrot.lane.b32.xlu1 %v761_v41, %s2268_s19  ;;  %v1813_v47 = vmul.f32 -1.442695, %v761_v41 }
 0xa3b   :  { %v763_v43 = vpop.f32.mrf.mxu0 }
 0xa3c   :  { %2172 = vpow2.f32 %v1813_v47 }
 0xa3d   :  { %v2003_v44 = vpop.f32.mrf.mxu0 }
 0xa43   :  { %v2171_v48 = vpop.eup %2170 }
 0xa44   :  { %v699_v49 = vadd.f32 1.0, %v2171_v48 }
 0xa46   :  { %2174 = vrcp.f32 %v699_v49 }
 0xa49   :  { %v2173_v50 = vpop.eup %2172 }
 0xa4a   :  { %v769_v51 = vadd.f32 1.0, %v2173_v50 }
 0xa4c   :  { %2176 = vrcp.f32 %v769_v51 }
 0xa53   :  { %v2175_v52 = vpop.eup %2174 }
 0xa59   :  { %v2177_v54 = vpop.eup %2176 }
 0xaa6   :  { %v704_v53 = vpop.permute.xlu0 %703 }
 0xaa7   :  { %v706_v11 = vmul.f32 %v2175_v52, %v704_v53 }
 0xaa9   :  { %708 = vrot.lane.b32.xlu0 %v706_v11, %s2269_s3 }
 0xaac   :  { %v774_v55 = vpop.permute.xlu1 %773 }
 0xaad   :  { %v776_v56 = vmul.f32 %v2177_v54, %v774_v55 }
 0xaaf   :  { %778 = vrot.lane.b32.xlu1 %v776_v56, %s2269_s3 }
 0xb1b   :  { %v709_v57 = vpop.permute.xlu0 %708 }
 0xb1c   :  { %v711_v58 = vadd.f32 %v709_v57, %v695_v36 }
 0xb1e   :  { %2178 = vtanh.f32 %v711_v58 }
 0xb21   :  { %v779_v59 = vpop.permute.xlu1 %778 }
 0xb22   :  { %v781_v60 = vadd.f32 %v779_v59, %v761_v41 }
 0xb24   :  { %2180 = vtanh.f32 %v781_v60 }
 0xb2b   :  { %v2179_v61 = vpop.eup %2178 }
 0xb2c   :  { %v713_v62 = vsub.f32 %v2480_v18, %v2179_v61 }
 0xb2e   :  { %715 = vrot.lane.b32.xlu0 %v713_v62, %s2270_s20 }
 0xb31   :  { %v2181_v63 = vpop.eup %2180 }
 0xb32   :  { %v783_v0 = vsub.f32 %v2485_v21, %v2181_v63 }
 0xb34   :  { %785 = vrot.lane.b32.xlu1 %v783_v0, %s2270_s20 }
 0xba0   :  { %v716_v2 = vpop.permute.xlu0 %715 }
 0xba1   :  { %v718_v4 = vmul.f32 %v2175_v52, %v716_v2 }
 0xba3   :  { %720 = vrot.lane.b32.xlu0 %v718_v4, %s2268_s19 }
 0xba6   :  { %v786_v5 = vpop.permute.xlu1 %785 }
 0xba7   :  { %v788_v6 = vmul.f32 %v2177_v54, %v786_v5 }
 0xba9   :  { %790 = vrot.lane.b32.xlu1 %v788_v6, %s2268_s19 }
 0xc15   :  { %v721_v8 = vpop.permute.xlu0 %720 }
 0xc16   :  { %v2523_v9 = vadd.f32 %v2179_v61, %v721_v8 }
 0xc18   :  { %v794_v10 = vpack.c.bf16 %v2523_v9, %v2523_v9 }
 0xc1a   :  { %843 = vrot.lane.b32.xlu0 %v794_v10, %s2269_s3 }
 0xc1b   :  { %v791_v12 = vpop.permute.xlu1 %790 }
 0xc1c   :  { %v2528_v13 = vadd.f32 %v2181_v63, %v791_v12 }
 0xc1e   :  { %v795_v15 = vpack.c.bf16 %v2528_v13, %v2528_v13 }
 0xc20   :  { %797 = vrot.lane.b32.xlu1 %v795_v15, %s2269_s3 }
 0xc8c   :  { %v844_v16 = vpop.permute.xlu0 %843 }
 0xc8d   :  { %2017 = vmatmul.mubr.msk.bf16.vlgmr.msra.gmra.mxu0 %vm125_vm3, %v844_v16 }
 0xc8e   :  { %2029 = vmatpush3.bf16.msra.mxu0 %v2370_v31  ;;  %2032 = vmatprep.mubr.msk.bf16.mxu0 %vm2266_vm1, %v2265_v1 }
 0xc8f   :  { %2030 = vmatprep.subr.bf16.mxu0 %v2265_v1 }
 0xc92   :  { %v798_v17 = vpop.permute.xlu1 %797  ;;  %2031 = vmatpush3.bf16.msra.mxu0 %v2382_v33 }
 0xc93   :  { %2009 = vmatmul.mubr.msk.bf16.vlgmr.msra.gmra.mxu1 %vm125_vm3, %v798_v17  ;;  %2044 = vmatprep.subr.bf16.mxu0 %v2265_v1 }
 0xc94   :  { %2021 = vmatpush3.bf16.msra.mxu1 %v2330_v3  ;;  %2024 = vmatprep.mubr.msk.bf16.mxu1 %vm2266_vm1, %v2265_v1 }
 0xc95   :  { %2022 = vmatprep.subr.bf16.mxu1 %v2265_v1 }
 0xc98   :  { %2023 = vmatpush3.bf16.msra.mxu1 %v2344_v7 }
 0xc99   :  { %2036 = vmatprep.subr.bf16.mxu1 %v2265_v1 }
 0xc9b   :  { %2025 = vmatmul.mubr.msk.bf16.vlgmr.msra.gmra.mxu1 %vm125_vm3, %v798_v17 }
 0xc9c   :  { %2037 = vmatpush3.bf16.msra.mxu1 %v2375_v32  ;;  %2040 = vmatprep.mubr.msk.bf16.mxu1 %vm2266_vm1, %v2265_v1 }
 0xc9d   :  { %2038 = vmatprep.subr.bf16.mxu1 %v2265_v1 }
 0xca0   :  { %2039 = vmatpush3.bf16.msra.mxu1 %v2387_v34 }
 0xca1   :  { %2052 = vmatprep.subr.bf16.mxu1 %v2265_v1 }
 0xd4d   :  { %v882_v18 = vpop.f32.mrf.mxu0 }
 0xd4f   :  { %v2018_v19 = vpop.f32.mrf.mxu0 }
 0xd51   :  { %v885_v20 = vpop.f32.mrf.mxu0 }
 0xd52   :  { %v1109_v20 = vrot.slane %v2361_v14, 2 }
 0xd53   :  { %v836_v21 = vpop.f32.mrf.mxu1  ;;  %v2019_v22 = vpop.f32.mrf.mxu0 }
 0xd54   :  { %v883_v23 = vadd.f32 %v882_v18, %v836_v21 }
 0xd55   :  { %v2010_v24 = vpop.f32.mrf.mxu1 }
 0xd56   :  { %v888_v25 = vadd.f32 %v2424_v46, %v883_v23 }
 0xd57   :  { %v839_v26 = vpop.f32.mrf.mxu1 }
 0xd58   :  { %896 = vrot.lane.b32.xlu0 %v888_v25, %s2268_s19  ;;  %v1816_v37 = vmul.f32 -1.442695, %v888_v25 }
 0xd59   :  { %v2011_v27 = vpop.f32.mrf.mxu1 }
 0xd5a   :  { %2182 = vpow2.f32 %v1816_v37 }
 0xd5b   :  { %v951_v28 = vpop.f32.mrf.mxu1 }
 0xd5c   :  { %v952_v29 = vadd.f32 %v951_v28, %v2361_v14 }
 0xd5d   :  { %v2026_v30 = vpop.f32.mrf.mxu1 }
 0xd5e   :  { %964 = vrot.lane.b32.xlu1 %v952_v29, %s2268_s19  ;;  %v1818_v38 = vmul.f32 -1.442695, %v952_v29 }
 0xd5f   :  { %v954_v35 = vpop.f32.mrf.mxu1 }
 0xd60   :  { %2184 = vpow2.f32 %v1818_v38 }
 0xd61   :  { %v2027_v36 = vpop.f32.mrf.mxu1 }
 0xd67   :  { %v2183_v39 = vpop.eup %2182 }
 0xd68   :  { %v892_v40 = vadd.f32 1.0, %v2183_v39 }
 0xd6a   :  { %2186 = vrcp.f32 %v892_v40 }
 0xd6d   :  { %v2185_v41 = vpop.eup %2184 }
 0xd6e   :  { %v960_v42 = vadd.f32 1.0, %v2185_v41 }
 0xd70   :  { %2188 = vrcp.f32 %v960_v42 }
 0xd77   :  { %v2187_v43 = vpop.eup %2186 }
 0xd7d   :  { %v2189_v47 = vpop.eup %2188 }
 0xdca   :  { %v897_v44 = vpop.permute.xlu0 %896 }
 0xdcb   :  { %v899_v45 = vmul.f32 %v2187_v43, %v897_v44 }
 0xdcd   :  { %901 = vrot.lane.b32.xlu0 %v899_v45, %s2269_s3 }
 0xdd0   :  { %v965_v48 = vpop.permute.xlu1 %964 }
 0xdd1   :  { %v967_v49 = vmul.f32 %v2189_v47, %v965_v48 }
 0xdd3   :  { %969 = vrot.lane.b32.xlu1 %v967_v49, %s2269_s3 }
 0xe3f   :  { %v902_v50 = vpop.permute.xlu0 %901 }
 0xe40   :  { %v904_v51 = vadd.f32 %v902_v50, %v888_v25 }
 0xe42   :  { %2190 = vtanh.f32 %v904_v51 }
 0xe45   :  { %v970_v52 = vpop.permute.xlu1 %969 }
 0xe46   :  { %v972_v53 = vadd.f32 %v970_v52, %v952_v29 }
 0xe48   :  { %2192 = vtanh.f32 %v972_v53 }
 0xe4f   :  { %v2191_v11 = vpop.eup %2190 }
 0xe50   :  { %v906_v54 = vsub.f32 %v2523_v9, %v2191_v11 }
 0xe52   :  { %908 = vrot.lane.b32.xlu0 %v906_v54, %s2270_s20 }
 0xe55   :  { %v2193_v55 = vpop.eup %2192 }
 0xe56   :  { %v974_v56 = vsub.f32 %v2528_v13, %v2193_v55 }
 0xe58   :  { %976 = vrot.lane.b32.xlu1 %v974_v56, %s2270_s20 }
 0xec4   :  { %v909_v57 = vpop.permute.xlu0 %908 }
 0xec5   :  { %v911_v58 = vmul.f32 %v2187_v43, %v909_v57 }
 0xec7   :  { %913 = vrot.lane.b32.xlu0 %v911_v58, %s2268_s19 }
 0xeca   :  { %v977_v59 = vpop.permute.xlu1 %976 }
 0xecb   :  { %v979_v60 = vmul.f32 %v2189_v47, %v977_v59 }
 0xecd   :  { %981 = vrot.lane.b32.xlu1 %v979_v60, %s2268_s19 }
 0xf39   :  { %v914_v61 = vpop.permute.xlu0 %913 }
 0xf3a   :  { %v2566_v62 = vadd.f32 %v2191_v11, %v914_v61 }
 0xf3c   :  { %v985_v63 = vpack.c.bf16 %v2566_v62, %v2566_v62 }
 0xf3e   :  { %1034 = vrot.lane.b32.xlu0 %v985_v63, %s2269_s3 }
 0xf3f   :  { %v982_v0 = vpop.permute.xlu1 %981 }
 0xf40   :  { %v2571_v2 = vadd.f32 %v2193_v55, %v982_v0 }
 0xf42   :  { %v986_v4 = vpack.c.bf16 %v2571_v2, %v2571_v2 }
 0xf44   :  { %988 = vrot.lane.b32.xlu1 %v986_v4, %s2269_s3 }
 0xfb0   :  { %v1035_v5 = vpop.permute.xlu0 %1034 }
 0xfb1   :  { %2041 = vmatmul.mubr.msk.bf16.vlgmr.msra.gmra.mxu1 %vm125_vm3, %v1035_v5  ;;  %v1302_v5 = vrot.slane %v2361_v14, 4 }
 0xfb2   :  { %2053 = vmatpush3.bf16.msra.mxu1 %v2370_v31  ;;  %2056 = vmatprep.mubr.msk.bf16.mxu1 %vm2266_vm1, %v2265_v1 }
 0xfb3   :  { %2054 = vmatprep.subr.bf16.mxu1 %v2265_v1 }
 0xfb6   :  { %v989_v6 = vpop.permute.xlu1 %988  ;;  %2055 = vmatpush3.bf16.msra.mxu1 %v2382_v33 }
 0xfb7   :  { %2033 = vmatmul.mubr.msk.bf16.vlgmr.msra.gmra.mxu0 %vm125_vm3, %v989_v6  ;;  %2068 = vmatprep.subr.bf16.mxu1 %v2265_v1 }
 0xfb8   :  { %2045 = vmatpush3.bf16.msra.mxu0 %v2330_v3  ;;  %2048 = vmatprep.mubr.msk.bf16.mxu0 %vm2266_vm1, %v2265_v1 }
 0xfb9   :  { %2046 = vmatprep.subr.bf16.mxu0 %v2265_v1 }
 0xfbc   :  { %2047 = vmatpush3.bf16.msra.mxu0 %v2344_v7 }
 0xfbd   :  { %2060 = vmatprep.subr.bf16.mxu0 %v2265_v1 }
 0xfbf   :  { %2049 = vmatmul.mubr.msk.bf16.vlgmr.msra.gmra.mxu0 %vm125_vm3, %v989_v6 }
 0xfc0   :  { %2061 = vmatpush3.bf16.msra.mxu0 %v2375_v32  ;;  %2064 = vmatprep.mubr.msk.bf16.mxu0 %vm2266_vm1, %v2265_v1 }
 0xfc1   :  { %2062 = vmatprep.subr.bf16.mxu0 %v2265_v1 }
 0xfc4   :  { %2063 = vmatpush3.bf16.msra.mxu0 %v2387_v34 }
 0xfc5   :  { %2076 = vmatprep.subr.bf16.mxu0 %v2265_v1 }
0x1071   :  { %v1073_v8 = vpop.f32.mrf.mxu1 }
0x1073   :  { %v2042_v9 = vpop.f32.mrf.mxu1 }
0x1075   :  { %v1076_v10 = vpop.f32.mrf.mxu1 }
0x1077   :  { %v1027_v12 = vpop.f32.mrf.mxu0  ;;  %v2043_v13 = vpop.f32.mrf.mxu1 }
0x1078   :  { %v1074_v15 = vadd.f32 %v1073_v8, %v1027_v12 }
0x1079   :  { %v2034_v16 = vpop.f32.mrf.mxu0 }
0x107a   :  { %v1079_v17 = vadd.f32 %v2424_v46, %v1074_v15 }
0x107b   :  { %v1030_v18 = vpop.f32.mrf.mxu0 }
0x107c   :  { %1087 = vrot.lane.b32.xlu0 %v1079_v17, %s2268_s19  ;;  %v1821_v26 = vmul.f32 -1.442695, %v1079_v17 }
0x107d   :  { %v2035_v19 = vpop.f32.mrf.mxu0 }
0x107e   :  { %2194 = vpow2.f32 %v1821_v26 }
0x107f   :  { %v1145_v21 = vpop.f32.mrf.mxu0 }
0x1080   :  { %v1146_v22 = vadd.f32 %v1145_v21, %v1109_v20 }
0x1081   :  { %v2050_v23 = vpop.f32.mrf.mxu0 }
0x1082   :  { %1158 = vrot.lane.b32.xlu1 %v1146_v22, %s2268_s19  ;;  %v1823_v27 = vmul.f32 -1.442695, %v1146_v22 }
0x1083   :  { %v1148_v24 = vpop.f32.mrf.mxu0 }
0x1084   :  { %2196 = vpow2.f32 %v1823_v27 }
0x1085   :  { %v2051_v25 = vpop.f32.mrf.mxu0 }
0x108b   :  { %v2195_v28 = vpop.eup %2194 }
0x108c   :  { %v1083_v29 = vadd.f32 1.0, %v2195_v28 }
0x108e   :  { %2198 = vrcp.f32 %v1083_v29 }
0x1091   :  { %v2197_v30 = vpop.eup %2196 }
0x1092   :  { %v1154_v35 = vadd.f32 1.0, %v2197_v30 }
0x1094   :  { %2200 = vrcp.f32 %v1154_v35 }
0x109b   :  { %v2199_v36 = vpop.eup %2198 }
0x10a1   :  { %v2201_v39 = vpop.eup %2200 }
0x10ee   :  { %v1088_v37 = vpop.permute.xlu0 %1087 }
0x10ef   :  { %v1090_v38 = vmul.f32 %v2199_v36, %v1088_v37 }
0x10f1   :  { %1092 = vrot.lane.b32.xlu0 %v1090_v38, %s2269_s3 }
0x10f4   :  { %v1159_v40 = vpop.permute.xlu1 %1158 }
0x10f5   :  { %v1161_v41 = vmul.f32 %v2201_v39, %v1159_v40 }
0x10f7   :  { %1163 = vrot.lane.b32.xlu1 %v1161_v41, %s2269_s3 }
0x1163   :  { %v1093_v42 = vpop.permute.xlu0 %1092 }
0x1164   :  { %v1095_v43 = vadd.f32 %v1093_v42, %v1079_v17 }
0x1166   :  { %2202 = vtanh.f32 %v1095_v43 }
0x1169   :  { %v1164_v44 = vpop.permute.xlu1 %1163 }
0x116a   :  { %v1166_v45 = vadd.f32 %v1164_v44, %v1146_v22 }
0x116c   :  { %2204 = vtanh.f32 %v1166_v45 }
0x1173   :  { %v2203_v47 = vpop.eup %2202 }
0x1174   :  { %v1097_v48 = vsub.f32 %v2566_v62, %v2203_v47 }
0x1176   :  { %1099 = vrot.lane.b32.xlu0 %v1097_v48, %s2270_s20 }
0x1179   :  { %v2205_v49 = vpop.eup %2204 }
0x117a   :  { %v1168_v50 = vsub.f32 %v2571_v2, %v2205_v49 }
0x117c   :  { %1170 = vrot.lane.b32.xlu1 %v1168_v50, %s2270_s20 }
0x11e8   :  { %v1100_v51 = vpop.permute.xlu0 %1099 }
0x11e9   :  { %v1102_v52 = vmul.f32 %v2199_v36, %v1100_v51  ;;  %v2237_v51 = vld [vmem:[%s2746_s4] sm:$0xff]  }
0x11eb   :  { %1104 = vrot.lane.b32.xlu0 %v1102_v52, %s2268_s19  ;;  %v2238_v52 = vld [vmem:[%s2744_s2 + $0x8] sm:$0xff]  }
0x11ee   :  { %v1171_v53 = vpop.permute.xlu1 %1170 }
0x11ef   :  { %v1173_v11 = vmul.f32 %v2201_v39, %v1171_v53  ;;  %v2239_v53 = vld [vmem:[%s2744_s2] sm:$0xff]  }
0x11f1   :  { %1175 = vrot.lane.b32.xlu1 %v1173_v11, %s2268_s19  ;;  %v2240_v11 = vld [vmem:[%s2747_s5 + $0x8] sm:$0xff]  }
0x125d   :  { %v1105_v54 = vpop.permute.xlu0 %1104 }
0x125e   :  { %v2609_v55 = vadd.f32 %v2203_v47, %v1105_v54  ;;  %v2241_v54 = vld [vmem:[%s2747_s5] sm:$0xff]  }
0x1260   :  { %v1179_v56 = vpack.c.bf16 %v2609_v55, %v2609_v55 }
0x1262   :  { %1228 = vrot.lane.b32.xlu0 %v1179_v56, %s2269_s3 }
0x1263   :  { %v1176_v57 = vpop.permute.xlu1 %1175 }
0x1264   :  { %v2614_v58 = vadd.f32 %v2205_v49, %v1176_v57  ;;  %v2236_v49 = vld [vmem:[%s2746_s4 + $0x8] sm:$0xff]  }
0x1266   :  { %v1180_v59 = vpack.c.bf16 %v2614_v58, %v2614_v58 }
0x1268   :  { %1182 = vrot.lane.b32.xlu1 %v1180_v59, %s2269_s3 }
0x12d4   :  { %v1229_v60 = vpop.permute.xlu0 %1228 }
0x12d5   :  { %2065 = vmatmul.mubr.msk.bf16.vlgmr.msra.gmra.mxu0 %vm125_vm3, %v1229_v60 }
0x12d6   :  { %2077 = vmatpush3.bf16.msra.mxu0 %v2370_v31  ;;  %2080 = vmatprep.mubr.msk.bf16.mxu0 %vm2266_vm1, %v2265_v1 }
0x12d7   :  { %2078 = vmatprep.subr.bf16.mxu0 %v2265_v1 }
0x12da   :  { %v1183_v61 = vpop.permute.xlu1 %1182  ;;  %2079 = vmatpush3.bf16.msra.mxu0 %v2382_v33 }
0x12db   :  { %2057 = vmatmul.mubr.msk.bf16.vlgmr.msra.gmra.mxu1 %vm125_vm3, %v1183_v61  ;;  %2092 = vmatprep.subr.bf16.mxu0 %v2265_v1 }
0x12dc   :  { %2069 = vmatpush3.bf16.msra.mxu1 %v2330_v3  ;;  %2072 = vmatprep.mubr.msk.bf16.mxu1 %vm2266_vm1, %v2265_v1 }
0x12dd   :  { %2070 = vmatprep.subr.bf16.mxu1 %v2265_v1 }
0x12e0   :  { %2071 = vmatpush3.bf16.msra.mxu1 %v2344_v7 }
0x12e1   :  { %2084 = vmatprep.subr.bf16.mxu1 %v2265_v1 }
0x12e3   :  { %2073 = vmatmul.mubr.msk.bf16.vlgmr.msra.gmra.mxu1 %vm125_vm3, %v1183_v61 }
0x12e4   :  { %2085 = vmatpush3.bf16.msra.mxu1 %v2375_v32  ;;  %2088 = vmatprep.mubr.msk.bf16.mxu1 %vm2266_vm1, %v2265_v1 }
0x12e5   :  { %2086 = vmatprep.subr.bf16.mxu1 %v2265_v1 }
0x12e8   :  { %2087 = vmatpush3.bf16.msra.mxu1 %v2387_v34 }
0x12e9   :  { %2100 = vmatprep.subr.bf16.mxu1 %v2265_v1 }
0x1395   :  { %v1267_v3 = vpop.f32.mrf.mxu0 }
0x1397   :  { %v2066_v31 = vpop.f32.mrf.mxu0 }
0x1399   :  { %v1270_v33 = vpop.f32.mrf.mxu0 }
0x139b   :  { %v1221_v62 = vpop.f32.mrf.mxu1  ;;  %v2067_v7 = vpop.f32.mrf.mxu0 }
0x139c   :  { %v1268_v63 = vadd.f32 %v1267_v3, %v1221_v62  ;;  %v1495_v62 = vrot.slane %v2361_v14, 6 }
0x139d   :  { %v2058_v0 = vpop.f32.mrf.mxu1 }
0x139e   :  { %v1273_v2 = vadd.f32 %v2424_v46, %v1268_v63 }
0x139f   :  { %v1224_v4 = vpop.f32.mrf.mxu1 }
0x13a0   :  { %1281 = vrot.lane.b32.xlu0 %v1273_v2, %s2268_s19  ;;  %v1826_v12 = vmul.f32 -1.442695, %v1273_v2 }
0x13a1   :  { %v2059_v32 = vpop.f32.mrf.mxu1 }
0x13a2   :  { %2206 = vpow2.f32 %v1826_v12 }
0x13a3   :  { %v1338_v6 = vpop.f32.mrf.mxu1 }
0x13a4   :  { %v1339_v8 = vadd.f32 %v1338_v6, %v1302_v5 }
0x13a5   :  { %v2074_v34 = vpop.f32.mrf.mxu1 }
0x13a6   :  { %1351 = vrot.lane.b32.xlu1 %v1339_v8, %s2268_s19  ;;  %v1828_v13 = vmul.f32 -1.442695, %v1339_v8 }
0x13a7   :  { %v1341_v9 = vpop.f32.mrf.mxu1 }
0x13a8   :  { %2208 = vpow2.f32 %v1828_v13 }
0x13a9   :  { %v2075_v10 = vpop.f32.mrf.mxu1 }
0x13af   :  { %v2207_v15 = vpop.eup %2206 }
0x13b0   :  { %v1277_v16 = vadd.f32 1.0, %v2207_v15 }
0x13b2   :  { %2210 = vrcp.f32 %v1277_v16 }
0x13b5   :  { %v2209_v17 = vpop.eup %2208 }
0x13b6   :  { %v1347_v18 = vadd.f32 1.0, %v2209_v17 }
0x13b8   :  { %2212 = vrcp.f32 %v1347_v18 }
0x13bf   :  { %v2211_v19 = vpop.eup %2210 }
0x13c5   :  { %v2213_v22 = vpop.eup %2212 }
0x1412   :  { %v1282_v20 = vpop.permute.xlu0 %1281 }
0x1413   :  { %v1284_v21 = vmul.f32 %v2211_v19, %v1282_v20 }
0x1415   :  { %1286 = vrot.lane.b32.xlu0 %v1284_v21, %s2269_s3 }
0x1418   :  { %v1352_v23 = vpop.permute.xlu1 %1351 }
0x1419   :  { %v1354_v24 = vmul.f32 %v2213_v22, %v1352_v23 }
0x141b   :  { %1356 = vrot.lane.b32.xlu1 %v1354_v24, %s2269_s3 }
0x1487   :  { %v1287_v25 = vpop.permute.xlu0 %1286 }
0x1488   :  { %v1289_v26 = vadd.f32 %v1287_v25, %v1273_v2 }
0x148a   :  { %2214 = vtanh.f32 %v1289_v26 }
0x148d   :  { %v1357_v27 = vpop.permute.xlu1 %1356 }
0x148e   :  { %v1359_v28 = vadd.f32 %v1357_v27, %v1339_v8 }
0x1490   :  { %2216 = vtanh.f32 %v1359_v28 }
0x1497   :  { %v2215_v29 = vpop.eup %2214 }
0x1498   :  { %v1291_v30 = vsub.f32 %v2609_v55, %v2215_v29 }
0x149a   :  { %1293 = vrot.lane.b32.xlu0 %v1291_v30, %s2270_s20 }
0x149d   :  { %v2217_v35 = vpop.eup %2216 }
0x149e   :  { %v1361_v36 = vsub.f32 %v2614_v58, %v2217_v35 }
0x14a0   :  { %1363 = vrot.lane.b32.xlu1 %v1361_v36, %s2270_s20 }
0x150c   :  { %v1294_v37 = vpop.permute.xlu0 %1293 }
0x150d   :  { %v1296_v38 = vmul.f32 %v2211_v19, %v1294_v37 }
0x150f   :  { %1298 = vrot.lane.b32.xlu0 %v1296_v38, %s2268_s19 }
0x1512   :  { %v1364_v39 = vpop.permute.xlu1 %1363 }
0x1513   :  { %v1366_v40 = vmul.f32 %v2213_v22, %v1364_v39 }
0x1515   :  { %1368 = vrot.lane.b32.xlu1 %v1366_v40, %s2268_s19 }
0x1581   :  { %v1299_v41 = vpop.permute.xlu0 %1298 }
0x1582   :  { %v2652_v42 = vadd.f32 %v2215_v29, %v1299_v41 }
0x1584   :  { %v1372_v43 = vpack.c.bf16 %v2652_v42, %v2652_v42 }
0x1586   :  { %1421 = vrot.lane.b32.xlu0 %v1372_v43, %s2269_s3 }
0x1587   :  { %v1369_v44 = vpop.permute.xlu1 %1368 }
0x1588   :  { %v2657_v45 = vadd.f32 %v2217_v35, %v1369_v44 }
0x158a   :  { %v1373_v47 = vpack.c.bf16 %v2657_v45, %v2657_v45 }
0x158c   :  { %1375 = vrot.lane.b32.xlu1 %v1373_v47, %s2269_s3 }
0x15f8   :  { %v1422_v48 = vpop.permute.xlu0 %1421 }
0x15f9   :  { %2089 = vmatmul.mubr.msk.bf16.vlgmr.msra.gmra.mxu1 %vm125_vm3, %v1422_v48  ;;  %v2242_v48 = vld [vmem:[%s2748_s6] ss:$0 sm:$0xff] }
0x15fa   :  { %2101 = vmatpush3.bf16.msra.mxu1 %v2236_v49  ;;  %2104 = vmatprep.mubr.msk.bf16.mxu1 %vm2266_vm1, %v2265_v1 }
0x15fb   :  { %2102 = vmatprep.subr.bf16.mxu1 %v2265_v1 }
0x15fe   :  { %v1376_v50 = vpop.permute.xlu1 %1375  ;;  %2103 = vmatpush3.bf16.msra.mxu1 %v2237_v51 }
0x15ff   :  { %2081 = vmatmul.mubr.msk.bf16.vlgmr.msra.gmra.mxu0 %vm125_vm3, %v1376_v50  ;;  %2116 = vmatprep.subr.mxu1 %v2265_v1 }
0x1600   :  { %2093 = vmatpush3.bf16.msra.mxu0 %v2238_v52  ;;  %2096 = vmatprep.mubr.msk.bf16.mxu0 %vm2266_vm1, %v2265_v1 }
0x1601   :  { %2094 = vmatprep.subr.bf16.mxu0 %v2265_v1 }
0x1604   :  { %2095 = vmatpush3.bf16.msra.mxu0 %v2239_v53 }
0x1605   :  { %2108 = vmatprep.subr.bf16.mxu0 %v2265_v1 }
0x1607   :  { %2097 = vmatmul.mubr.msk.bf16.vlgmr.msra.gmra.mxu0 %vm125_vm3, %v1376_v50 }
0x1608   :  { %2109 = vmatpush3.bf16.msra.mxu0 %v2240_v11  ;;  %2112 = vmatprep.mubr.msk.bf16.mxu0 %vm2266_vm1, %v2265_v1 }
0x1609   :  { %2110 = vmatprep.subr.bf16.mxu0 %v2265_v1 }
0x160c   :  { %2111 = vmatpush3.bf16.msra.mxu0 %v2241_v54 }
0x16b9   :  { %v1460_v55 = vpop.f32.mrf.mxu1 }
0x16bb   :  { %v2090_v56 = vpop.f32.mrf.mxu1 }
0x16bd   :  { %v1463_v57 = vpop.f32.mrf.mxu1 }
0x16bf   :  { %v1414_v58 = vpop.f32.mrf.mxu0  ;;  %v2091_v59 = vpop.f32.mrf.mxu1 }
0x16c0   :  { %v1461_v60 = vadd.f32 %v1460_v55, %v1414_v58 }
0x16c1   :  { %v2082_v61 = vpop.f32.mrf.mxu0 }
0x16c2   :  { %v1466_v3 = vadd.f32 %v2424_v46, %v1461_v60  ;;  %v1691_v61 = vld [vmem:[%s2749_s7 + $0x18] sm:$0xff] }
0x16c3   :  { %v1417_v31 = vpop.f32.mrf.mxu0 }
0x16c4   :  { %1474 = vrot.lane.b32.xlu1 %v1466_v3, %s2268_s19  ;;  %v1831_v32 = vmul.f32 -1.442695, %v1466_v3  ;;  %v1689_v31 = vld [vmem:[%s2749_s7 + $0x8] sm:$0xff] }
0x16c5   :  { %v2083_v33 = vpop.f32.mrf.mxu0 }
0x16c6   :  { %2218 = vpow2.f32 %v1831_v32  ;;  %v1688_v33 = vld [vmem:[%s2749_s7] sm:$0xff] }
0x16c7   :  { %v1531_v7 = vpop.f32.mrf.mxu0 }
0x16c8   :  { %v1532_v63 = vadd.f32 %v1531_v7, %v1495_v62 }
0x16c9   :  { %v2098_v0 = vpop.f32.mrf.mxu0 }
0x16ca   :  { %1544 = vrot.lane.b32.xlu0 %v1532_v63, %s2268_s19  ;;  %v1833_v5 = vmul.f32 -1.442695, %v1532_v63 }
0x16cb   :  { %v1534_v2 = vpop.f32.mrf.mxu0 }
0x16cc   :  { %2220 = vpow2.f32 %v1833_v5 }
0x16cd   :  { %v2099_v4 = vpop.f32.mrf.mxu0 }
0x16ce   :  { %v1837_v4 = vld [vmem:[%s2750_s8] ss:$0 sm:$0xff] }
0x16d3   :  { %v2219_v6 = vpop.eup %2218 }
0x16d4   :  { %v1470_v8 = vadd.f32 1.0, %v2219_v6 }
0x16d6   :  { %2222 = vrcp.f32 %v1470_v8 }
0x16d9   :  { %v2221_v46 = vpop.eup %2220 }
0x16da   :  { %v1540_v34 = vadd.f32 1.0, %v2221_v46 }
0x16dc   :  { %2224 = vrcp.f32 %v1540_v34 }
0x16e3   :  { %v2223_v9 = vpop.eup %2222 }
0x16e9   :  { %v2225_v12 = vpop.eup %2224 }
0x1736   :  { %v1475_v10 = vpop.permute.xlu1 %1474 }
0x1737   :  { %v1477_v14 = vmul.f32 %v2223_v9, %v1475_v10 }
0x1739   :  { %1479 = vrot.lane.b32.xlu1 %v1477_v14, %s2269_s3 }
0x173c   :  { %v1545_v13 = vpop.permute.xlu0 %1544 }
0x173d   :  { %v1547_v15 = vmul.f32 %v2225_v12, %v1545_v13 }
0x173f   :  { %1549 = vrot.lane.b32.xlu0 %v1547_v15, %s2269_s3 }
0x17ab   :  { %v1480_v16 = vpop.permute.xlu1 %1479 }
0x17ac   :  { %v1482_v17 = vadd.f32 %v1480_v16, %v1466_v3  ;;  %v1690_v3 = vld [vmem:[%s2749_s7 + $0x10] sm:$0xff]  ;;  %s2271_s7 = smov [#allocation2]  }
0x17ad   :  { %s1782_s29 = sshll.u32 %s2271_s7, 4  ;;  %s1783_s29 = int_to_ptr.vmem [resolvable:$true] %s1782_s29 }
0x17ae   :  { %2226 = vtanh.f32 %v1482_v17  ;;  %p2248_p1 = scmp.lt.s32.totalorder %s1783_s29, %s1783_s29 }
0x17b1   :  { %v1550_v18 = vpop.permute.xlu0 %1549 }
0x17b2   :  { %v1552_v19 = vadd.f32 %v1550_v18, %v1532_v63 }
0x17b4   :  { %2228 = vtanh.f32 %v1552_v19 }
0x17bb   :  { %v2227_v20 = vpop.eup %2226 }
0x17bc   :  { %v1484_v21 = vsub.f32 %v2652_v42, %v2227_v20 }
0x17be   :  { %1486 = vrot.lane.b32.xlu1 %v1484_v21, %s2270_s20 }
0x17c1   :  { %v2229_v22 = vpop.eup %2228 }
0x17c2   :  { %v1554_v23 = vsub.f32 %v2657_v45, %v2229_v22 }
0x17c4   :  { %1556 = vrot.lane.b32.xlu0 %v1554_v23, %s2270_s20 }
0x1830   :  { %v1487_v24 = vpop.permute.xlu1 %1486 }
0x1831   :  { %v1489_v25 = vmul.f32 %v2223_v9, %v1487_v24 }
0x1833   :  { %1491 = vrot.lane.b32.xlu1 %v1489_v25, %s2268_s19 }
0x1836   :  { %v1557_v26 = vpop.permute.xlu0 %1556 }
0x1837   :  { %v1559_v27 = vmul.f32 %v2225_v12, %v1557_v26 }
0x1839   :  { %1561 = vrot.lane.b32.xlu0 %v1559_v27, %s2268_s19 }
0x18a5   :  { %v1492_v28 = vpop.permute.xlu1 %1491 }
0x18a6   :  { %v1494_v29 = vadd.f32 %v2227_v20, %v1492_v28 }
0x18a8   :  { %v1565_v30 = vpack.c.bf16 %v1494_v29, %v1494_v29 }
0x18aa   :  { %1614 = vrot.lane.b32.xlu0 %v1565_v30, %s2269_s3 }
0x18ab   :  { %v1562_v35 = vpop.permute.xlu0 %1561 }
0x18ac   :  { %v1564_v36 = vadd.f32 %v2229_v22, %v1562_v35 }
0x18ae   :  { %v1566_v37 = vpack.c.bf16 %v1564_v36, %v1564_v36 }
0x18b0   :  { %1568 = vrot.lane.b32.xlu1 %v1566_v37, %s2269_s3 }
0x191c   :  { %v1615_v38 = vpop.permute.xlu0 %1614 }
0x191d   :  { %2113 = vmatmul.mubr.msk.bf16.vlgmr.msra.gmra.mxu0 %vm125_vm3, %v1615_v38 }
0x1922   :  { %v1569_v39 = vpop.permute.xlu1 %1568 }
0x1923   :  { %2105 = vmatmul.mubr.msk.bf16.vlgmr.msra.gmra.mxu1 %vm125_vm3, %v1569_v39 }
0x1924   :  { %2124 = vmatprep.mubr.msk.f32.mxu1 %vm2266_vm1, %v2265_v1  ;;  %2117 = vmatpush3.msra.mxu1 %v1691_v61 }
0x1925   :  { %2118 = vmatprep.subr.mxu1 %v2265_v1 }
0x1926   :  { %2119 = vmatpush3.msra.mxu1 %v1690_v3 }
0x1927   :  { %2120 = vmatprep.subr.mxu1 %v2265_v1 }
0x1928   :  { %2121 = vmatpush3.msra.mxu1 %v1689_v31 }
0x1929   :  { %2122 = vmatprep.subr.mxu1 %v2265_v1 }
0x192a   :  { %2123 = vmatpush3.msra.mxu1 %v1688_v33 }
0x19dd   :  { %v1653_v40 = vpop.f32.mrf.mxu0 }
0x19df   :  { %v2114_v41 = vpop.f32.mrf.mxu0 }
0x19e1   :  { %v1656_v42 = vpop.f32.mrf.mxu0 }
0x19e3   :  { %v1607_v43 = vpop.f32.mrf.mxu1  ;;  %v2115_v44 = vpop.f32.mrf.mxu0 }
0x19e4   :  { %v1654_v45 = vadd.f32 %v1653_v40, %v1607_v43 }
0x19e5   :  { %v2106_v47 = vpop.f32.mrf.mxu1 }
0x19e6   :  { %v1659_v49 = vadd.f32 %v2242_v48, %v1654_v45 }
0x19e7   :  { %v1610_v50 = vpop.f32.mrf.mxu1 }
0x19e8   :  { %1667 = vrot.lane.b32.xlu1 %v1659_v49, %s2268_s19  ;;  %v1836_v52 = vmul.f32 -1.442695, %v1659_v49 }
0x19e9   :  { %v2107_v51 = vpop.f32.mrf.mxu1 }
0x19ea   :  { %2230 = vpow2.f32 %v1836_v52 }
0x19f7   :  { %v2231_v53 = vpop.eup %2230 }
0x19f8   :  { %v1663_v11 = vadd.f32 1.0, %v2231_v53 }
0x19fa   :  { %2232 = vrcp.f32 %v1663_v11 }
0x1a07   :  { %v2233_v54 = vpop.eup %2232 }
0x1a5a   :  { %v1668_v55 = vpop.permute.xlu1 %1667 }
0x1a5b   :  { %v1670_v56 = vmul.f32 %v2233_v54, %v1668_v55 }
0x1a5d   :  { %1672 = vrot.lane.b32.xlu0 %v1670_v56, %s2269_s3 }
0x1acf   :  { %v1673_v57 = vpop.permute.xlu0 %1672 }
0x1ad0   :  { %v1675_v58 = vadd.f32 %v1673_v57, %v1659_v49 }
0x1ad2   :  { %2234 = vtanh.f32 %v1675_v58 }
0x1adf   :  { %v2235_v59 = vpop.eup %2234 }
0x1ae0   :  { %v1677_v60 = vsub.f32 %v1494_v29, %v2235_v59 }
0x1ae2   :  { %1679 = vrot.lane.b32.xlu1 %v1677_v60, %s2270_s20 }
0x1b54   :  { %v1680_v62 = vpop.permute.xlu1 %1679 }
0x1b55   :  { %v1682_v7 = vmul.f32 %v2233_v54, %v1680_v62 }
0x1b57   :  { %1684 = vrot.lane.b32.xlu0 %v1682_v7, %s2268_s19  ;;  %s2243_s19 = scalar_lea.vmem %s1783_s29, 32 }
0x1b58   :  { %p2244_p0 = scmp.ne.s32.totalorder %s1783_s29, %s2243_s19  ;;  %p2249_p2 = scmp.lt.s32.totalorder %s2243_s19, %s2243_s19 }
0x1b5a   :  { %p2250_p3 = por %p2249_p2, %p2248_p1 }
0x1b5c   :  { %p2251_p4 = pnand %p2250_p3, %p2244_p0 }
0x1bc9   :  { %v1685_v63 = vpop.permute.xlu0 %1684 }
0x1bca   :  { %v1687_v0 = vadd.f32 %v2235_v59, %v1685_v63 }
0x1bcc   :  { %1700 = vrot.lane.b32.xlu1 %v1687_v0, %s2269_s3 }
0x1c3e   :  { %v1701_v2 = vpop.permute.xlu1 %1700 }
0x1c3f   :  { %2125 = vmatmul.mubr.msk.f32.vlgmr.msra.gmra.mxu1 %vm125_vm3, %v1701_v2 }
0x1cff   :  { %v1770_v32 = vpop.f32.mrf.mxu1 }
0x1d00   :  { %v1771_v1 = vadd.f32 %v1837_v4, %v1770_v32 }
0x1d01   :  { %v2126_v5 = vpop.f32.mrf.mxu1 }
0x1d02   :  { %1775 = vst.msk [vmem:[#allocation2] sm:$0x3] %vm1774_vm4, %v1771_v1 }
0x1d03   :  { %2254 = shalt.err (!%p2251_p4)
}
0x1d04   :  { %1785 = dma.vmem_to_hbm [thread:$0]  %s1783_s29, 32, %s2751_s9, [#allocation3]  }
0x1d05   :  { %2263 = dma.done.wait [#allocation3], 32  }
0x1d06   :  { %2264 = vsyncadd [#allocation3], 4294967264 }
0x1d07   :  { %1789 = vsyncpa [#allocation3], 1 }

</bundles_post_ra>
